<compile_context>
chip_gen: v7x
topology: tpu7x:2x2x1
jax: 0.10.0
libtpu: 0.0.40
codegen_flags: <defaults>
</compile_context>

<pallas_src>
import math
from functools import partial

import jax
import jax.numpy as jnp
from jax.experimental import pallas as pl
from jax.experimental.pallas import tpu as pltpu

NUM_HEADS = 4
LN_EPS = 1e-5
NEG_INF = -1e30


def _layer_norm(x, gamma, beta):
    mu = jnp.mean(x, axis=-1, keepdims=True)
    var = jnp.mean((x - mu) ** 2, axis=-1, keepdims=True)
    return (x - mu) * jax.lax.rsqrt(var + LN_EPS) * gamma + beta


def _make_sa_kernel(batch, seq_len, h_size):
    B, S, H = batch, seq_len, h_size
    M = B * S
    dH = H // NUM_HEADS
    scale = 1.0 / math.sqrt(dH)
    inv_sqrt2 = 1.0 / math.sqrt(2.0)
    # lhs (M, dH) . rhs (M, dH) contracting the last dims  ==  q @ k.T (no XLU transpose)
    ddn = (((1,), (1,)), ((), ()))

    def kernel(x_ref, mask_ref, ln1_g, ln1_b, wqkv, bqkv, wo, bo,
               ln2_g, ln2_b, w1, b1, w2, b2, out_ref):
        # ---- hoist small parameter loads once ----
        g1, be1 = ln1_g[...], ln1_b[...]
        g2, be2 = ln2_g[...], ln2_b[...]
        w_qkv, b_qkv = wqkv[...], bqkv[...]
        w_o, b_o = wo[...], bo[...]
        w_1, b_1 = w1[...], b1[...]
        w_2, b_2 = w2[...], b2[...]
        mask = mask_ref[...]                                     # (M, M) additive mask

        # ---- (B, H, S) NCHW-style tile -> tokens (M, H), transposed in VMEM ----
        toks = jnp.concatenate(
            [jnp.transpose(x_ref[b]) for b in range(B)], axis=0)  # (M, H) float32

        # ---- LayerNorm 1 (pre-attention) ----
        x_ln = _layer_norm(toks, g1, be1)

        # ---- QKV projection for all batches/tokens at once ----
        qkv = jnp.dot(x_ln, w_qkv, preferred_element_type=jnp.float32) + b_qkv  # (M, 3H)

        # ---- multi-head attention (heads unrolled; batches folded via block-diag mask) ----
        attn_proj = jnp.zeros((M, H), jnp.float32)
        for h in range(NUM_HEADS):
            qh = qkv[:, h * dH:(h + 1) * dH] * scale             # (M, dH)
            kh = qkv[:, H + h * dH:H + (h + 1) * dH]
            vh = qkv[:, 2 * H + h * dH:2 * H + (h + 1) * dH]
            s = jax.lax.dot_general(qh, kh, ddn,
                                    preferred_element_type=jnp.float32) + mask  # (M, M)
            s = s - jnp.max(s, axis=-1, keepdims=True)
            p = jnp.exp(s)
            p = p * pl.reciprocal(jnp.sum(p, axis=-1, keepdims=True), approx=True)
            ctx = jnp.dot(p, vh, preferred_element_type=jnp.float32)            # (M, dH)
            # fold this head's slice of the output projection (== concat(heads) @ W_o)
            attn_proj = attn_proj + jnp.dot(ctx, w_o[h * dH:(h + 1) * dH, :],
                                            preferred_element_type=jnp.float32)
        attn_proj = attn_proj + b_o

        # ---- residual 1 ----
        y = attn_proj + toks

        # ---- fc: LayerNorm -> Linear -> GELU(exact erf) -> Linear, residual ----
        y_ln = _layer_norm(y, g2, be2)
        h1 = jnp.dot(y_ln, w_1, preferred_element_type=jnp.float32) + b_1
        h1 = 0.5 * h1 * (1.0 + jax.lax.erf(h1 * inv_sqrt2))
        h2 = jnp.dot(h1, w_2, preferred_element_type=jnp.float32) + b_2
        out = h2 + y                                             # (M, H)

        # ---- tokens -> (B, H, S), transposed back in VMEM ----
        for b in range(B):
            out_ref[b] = jnp.transpose(out[b * S:(b + 1) * S, :])

    return kernel


def make_params(h_size, key):
    """Deterministic synthetic parameters (shapes match the PyTorch module)."""
    ks = jax.random.split(key, 8)
    f32 = jnp.float32
    return {
        "ln1_g": jnp.ones((1, h_size), f32),
        "ln1_b": jnp.zeros((1, h_size), f32),
        # nn.MultiheadAttention in_proj_weight (3H, H) -> stored transposed (H, 3H)
        "wqkv": (0.02 * jax.random.normal(ks[0], (3 * h_size, h_size), f32)).T,
        "bqkv": (0.01 * jax.random.normal(ks[1], (3 * h_size,), f32)).reshape(1, -1),
        # out_proj weight (H, H) -> transposed (H, H)
        "wo": (0.02 * jax.random.normal(ks[2], (h_size, h_size), f32)).T,
        "bo": (0.01 * jax.random.normal(ks[3], (h_size,), f32)).reshape(1, -1),
        "ln2_g": jnp.ones((1, h_size), f32),
        "ln2_b": jnp.zeros((1, h_size), f32),
        # fc Linear weights (H, H) -> transposed
        "w1": (0.02 * jax.random.normal(ks[4], (h_size, h_size), f32)).T,
        "b1": (0.01 * jax.random.normal(ks[5], (h_size,), f32)).reshape(1, -1),
        "w2": (0.02 * jax.random.normal(ks[6], (h_size, h_size), f32)).T,
        "b2": (0.01 * jax.random.normal(ks[7], (h_size,), f32)).reshape(1, -1),
    }


@partial(jax.jit, static_argnums=(2, 3))
def sa_wrapper_forward(x, params, h_size, num_s):
    """x: (B, h_size, num_s, num_s) float32  ->  same shape."""
    B = x.shape[0]
    S = num_s * num_s
    M = B * S

    # PyTorch view(-1, H, S): pure reshape, no transpose — layout swap happens in-kernel.
    x_bhs = x.reshape(B, h_size, S)

    # Block-diagonal additive mask so folded batches don't attend across each other.
    tok_batch = jnp.repeat(jnp.arange(B, dtype=jnp.int32), S)          # (M,)
    mask = jnp.where(tok_batch[:, None] == tok_batch[None, :], 0.0, NEG_INF)
    mask = mask.astype(jnp.float32)                                    # (M, M)

    weight_names = ["ln1_g", "ln1_b", "wqkv", "bqkv", "wo", "bo",
                    "ln2_g", "ln2_b", "w1", "b1", "w2", "b2"]
    weights = [params[n] for n in weight_names]

    def full(a):
        return pl.BlockSpec(a.shape, lambda i: (0,) * a.ndim)

    out = pl.pallas_call(
        _make_sa_kernel(B, S, h_size),
        out_shape=jax.ShapeDtypeStruct((B, h_size, S), jnp.float32),
        grid_spec=pltpu.PrefetchScalarGridSpec(
            num_scalar_prefetch=0,
            grid=(1,),                                   # whole problem in one step
            in_specs=[pl.BlockSpec((B, h_size, S), lambda i: (0, 0, 0)),
                      full(mask)]
                     + [full(w) for w in weights],
            out_specs=pl.BlockSpec((B, h_size, S), lambda i: (0, 0, 0)),
        ),
        compiler_params=pltpu.CompilerParams(dimension_semantics=("arbitrary",)),
    )(x_bhs, mask, *weights)

    # PyTorch swapaxes(2,1).view(-1, H, num_s, num_s): kernel already emitted (B, H, S).
    return out.reshape(B, h_size, num_s, num_s)


if __name__ == "__main__":
    h_size = 32
    num_s = 4          # seq length S = num_s * num_s = 16
    B = 2

    key = jax.random.PRNGKey(0)
    k_x, k_p = jax.random.split(key)
    x = jax.random.normal(k_x, (B, h_size, num_s, num_s), jnp.float32)
    params = make_params(h_size, k_p)

    y = sa_wrapper_forward(x, params, h_size, num_s)
    jax.block_until_ready(y)
    assert y.shape == (B, h_size, num_s, num_s)
    print("KERNEL_OK")
</pallas_src>

<mosaic_0001>
module attributes {stable_mosaic.version = 11 : i64} {
  func.func @kernel(%arg0: i32, %arg1: memref<2x32x16xf32, #tpu.memory_space<vmem>>, %arg2: memref<32x32xf32, #tpu.memory_space<vmem>>, %arg3: memref<1x32xf32, #tpu.memory_space<vmem>>, %arg4: memref<1x32xf32, #tpu.memory_space<vmem>>, %arg5: memref<32x96xf32, #tpu.memory_space<vmem>>, %arg6: memref<1x96xf32, #tpu.memory_space<vmem>>, %arg7: memref<32x32xf32, #tpu.memory_space<vmem>>, %arg8: memref<1x32xf32, #tpu.memory_space<vmem>>, %arg9: memref<1x32xf32, #tpu.memory_space<vmem>>, %arg10: memref<1x32xf32, #tpu.memory_space<vmem>>, %arg11: memref<32x32xf32, #tpu.memory_space<vmem>>, %arg12: memref<1x32xf32, #tpu.memory_space<vmem>>, %arg13: memref<32x32xf32, #tpu.memory_space<vmem>>, %arg14: memref<1x32xf32, #tpu.memory_space<vmem>>, %arg15: memref<2x32x16xf32, #tpu.memory_space<vmem>>) attributes {dimension_semantics = [#tpu.dimension_semantics<arbitrary>], iteration_bounds = array<i64: 1>, scalar_prefetch = 0 : i64, scratch_operands = 0 : i64, tpu.core_type = #tpu.core_type<tc>, window_params = [{pipeline_mode = #tpu.pipeline_mode<synchronous>, transform_indices = @transform_0, window_bounds = array<i64: 2, 32, 16>}, {pipeline_mode = #tpu.pipeline_mode<synchronous>, transform_indices = @transform_1, window_bounds = array<i64: 32, 32>}, {pipeline_mode = #tpu.pipeline_mode<synchronous>, transform_indices = @transform_2, window_bounds = array<i64: 1, 32>}, {pipeline_mode = #tpu.pipeline_mode<synchronous>, transform_indices = @transform_3, window_bounds = array<i64: 1, 32>}, {pipeline_mode = #tpu.pipeline_mode<synchronous>, transform_indices = @transform_4, window_bounds = array<i64: 32, 96>}, {pipeline_mode = #tpu.pipeline_mode<synchronous>, transform_indices = @transform_5, window_bounds = array<i64: 1, 96>}, {pipeline_mode = #tpu.pipeline_mode<synchronous>, transform_indices = @transform_6, window_bounds = array<i64: 32, 32>}, {pipeline_mode = #tpu.pipeline_mode<synchronous>, transform_indices = @transform_7, window_bounds = array<i64: 1, 32>}, {pipeline_mode = #tpu.pipeline_mode<synchronous>, transform_indices = @transform_8, window_bounds = array<i64: 1, 32>}, {pipeline_mode = #tpu.pipeline_mode<synchronous>, transform_indices = @transform_9, window_bounds = array<i64: 1, 32>}, {pipeline_mode = #tpu.pipeline_mode<synchronous>, transform_indices = @transform_10, window_bounds = array<i64: 32, 32>}, {pipeline_mode = #tpu.pipeline_mode<synchronous>, transform_indices = @transform_11, window_bounds = array<i64: 1, 32>}, {pipeline_mode = #tpu.pipeline_mode<synchronous>, transform_indices = @transform_12, window_bounds = array<i64: 32, 32>}, {pipeline_mode = #tpu.pipeline_mode<synchronous>, transform_indices = @transform_13, window_bounds = array<i64: 1, 32>}, {pipeline_mode = #tpu.pipeline_mode<synchronous>, transform_indices = @transform_14, window_bounds = array<i64: 2, 32, 16>}]} {
    %c0 = arith.constant 0 : index
    %c0_0 = arith.constant 0 : index
    %0 = vector.load %arg3[%c0, %c0_0] : memref<1x32xf32, #tpu.memory_space<vmem>>, vector<1x32xf32>
    %c0_1 = arith.constant 0 : index
    %c0_2 = arith.constant 0 : index
    %1 = vector.load %arg4[%c0_1, %c0_2] : memref<1x32xf32, #tpu.memory_space<vmem>>, vector<1x32xf32>
    %c0_3 = arith.constant 0 : index
    %c0_4 = arith.constant 0 : index
    %2 = vector.load %arg9[%c0_3, %c0_4] : memref<1x32xf32, #tpu.memory_space<vmem>>, vector<1x32xf32>
    %c0_5 = arith.constant 0 : index
    %c0_6 = arith.constant 0 : index
    %3 = vector.load %arg10[%c0_5, %c0_6] : memref<1x32xf32, #tpu.memory_space<vmem>>, vector<1x32xf32>
    %c0_7 = arith.constant 0 : index
    %c0_8 = arith.constant 0 : index
    %4 = vector.load %arg5[%c0_7, %c0_8] : memref<32x96xf32, #tpu.memory_space<vmem>>, vector<32x96xf32>
    %c0_9 = arith.constant 0 : index
    %c0_10 = arith.constant 0 : index
    %5 = vector.load %arg6[%c0_9, %c0_10] : memref<1x96xf32, #tpu.memory_space<vmem>>, vector<1x96xf32>
    %c0_11 = arith.constant 0 : index
    %c0_12 = arith.constant 0 : index
    %6 = vector.load %arg7[%c0_11, %c0_12] : memref<32x32xf32, #tpu.memory_space<vmem>>, vector<32x32xf32>
    %c0_13 = arith.constant 0 : index
    %c0_14 = arith.constant 0 : index
    %7 = vector.load %arg8[%c0_13, %c0_14] : memref<1x32xf32, #tpu.memory_space<vmem>>, vector<1x32xf32>
    %c0_15 = arith.constant 0 : index
    %c0_16 = arith.constant 0 : index
    %8 = vector.load %arg11[%c0_15, %c0_16] : memref<32x32xf32, #tpu.memory_space<vmem>>, vector<32x32xf32>
    %c0_17 = arith.constant 0 : index
    %c0_18 = arith.constant 0 : index
    %9 = vector.load %arg12[%c0_17, %c0_18] : memref<1x32xf32, #tpu.memory_space<vmem>>, vector<1x32xf32>
    %c0_19 = arith.constant 0 : index
    %c0_20 = arith.constant 0 : index
    %10 = vector.load %arg13[%c0_19, %c0_20] : memref<32x32xf32, #tpu.memory_space<vmem>>, vector<32x32xf32>
    %c0_21 = arith.constant 0 : index
    %c0_22 = arith.constant 0 : index
    %11 = vector.load %arg14[%c0_21, %c0_22] : memref<1x32xf32, #tpu.memory_space<vmem>>, vector<1x32xf32>
    %c0_23 = arith.constant 0 : index
    %c0_24 = arith.constant 0 : index
    %12 = vector.load %arg2[%c0_23, %c0_24] : memref<32x32xf32, #tpu.memory_space<vmem>>, vector<32x32xf32>
    %c0_25 = arith.constant 0 : index
    %c0_26 = arith.constant 0 : index
    %c0_27 = arith.constant 0 : index
    %13 = vector.load %arg1[%c0_25, %c0_26, %c0_27] : memref<2x32x16xf32, #tpu.memory_space<vmem>>, vector<1x32x16xf32>
    %14 = vector.shape_cast %13 : vector<1x32x16xf32> to vector<32x16xf32>
    %15 = tpu.transpose %14, [1, 0] : vector<32x16xf32> -> vector<16x32xf32>
    %c1 = arith.constant 1 : index
    %c0_28 = arith.constant 0 : index
    %c0_29 = arith.constant 0 : index
    %16 = vector.load %arg1[%c1, %c0_28, %c0_29] : memref<2x32x16xf32, #tpu.memory_space<vmem>>, vector<1x32x16xf32>
    %17 = vector.shape_cast %16 : vector<1x32x16xf32> to vector<32x16xf32>
    %18 = tpu.transpose %17, [1, 0] : vector<32x16xf32> -> vector<16x32xf32>
    %19 = tpu.concatenate %15, %18 in 0 : vector<16x32xf32>, vector<16x32xf32> -> vector<32x32xf32>
    %cst = arith.constant dense<0.000000e+00> : vector<32xf32>
    %20 = vector.multi_reduction <add>, %19, %cst [1] : vector<32x32xf32> to vector<32xf32>
    %21 = vector.shape_cast %20 : vector<32xf32> to vector<32x1xf32>
    %cst_30 = arith.constant 3.200000e+01 : f32
    %22 = vector.broadcast %cst_30 : f32 to vector<32x1xf32>
    %23 = arith.divf %21, %22 : vector<32x1xf32>
    %24 = vector.broadcast %23 : vector<32x1xf32> to vector<32x32xf32>
    %25 = arith.subf %19, %24 : vector<32x32xf32>
    %26 = arith.mulf %25, %25 : vector<32x32xf32>
    %cst_31 = arith.constant dense<0.000000e+00> : vector<32xf32>
    %27 = vector.multi_reduction <add>, %26, %cst_31 [1] : vector<32x32xf32> to vector<32xf32>
    %28 = vector.shape_cast %27 : vector<32xf32> to vector<32x1xf32>
    %cst_32 = arith.constant 3.200000e+01 : f32
    %29 = vector.broadcast %cst_32 : f32 to vector<32x1xf32>
    %30 = arith.divf %28, %29 : vector<32x1xf32>
    %31 = vector.broadcast %23 : vector<32x1xf32> to vector<32x32xf32>
    %32 = arith.subf %19, %31 : vector<32x32xf32>
    %cst_33 = arith.constant 9.99999974E-6 : f32
    %33 = vector.broadcast %cst_33 : f32 to vector<32x1xf32>
    %34 = arith.addf %30, %33 : vector<32x1xf32>
    %35 = math.rsqrt %34 : vector<32x1xf32>
    %36 = vector.broadcast %35 : vector<32x1xf32> to vector<32x32xf32>
    %37 = arith.mulf %32, %36 : vector<32x32xf32>
    %38 = vector.broadcast %0 : vector<1x32xf32> to vector<32x32xf32>
    %39 = arith.mulf %37, %38 : vector<32x32xf32>
    %40 = vector.broadcast %1 : vector<1x32xf32> to vector<32x32xf32>
    %41 = arith.addf %39, %40 : vector<32x32xf32>
    %cst_34 = arith.constant dense<0.000000e+00> : vector<32x96xf32>
    %42 = tpu.matmul %41, %4, %cst_34 {dimension_numbers = #tpu.dot_dimension_numbers<[1], [0], [0], [1], [0, 0, 1, 1], [], []>} : vector<32x32xf32>, vector<32x96xf32>, vector<32x96xf32> -> vector<32x96xf32>
    %43 = vector.broadcast %5 : vector<1x96xf32> to vector<32x96xf32>
    %44 = arith.addf %42, %43 : vector<32x96xf32>
    %cst_35 = arith.constant 0.000000e+00 : f32
    %45 = vector.broadcast %cst_35 : f32 to vector<32x32xf32>
    %46 = vector.extract_strided_slice %44 {offsets = [0, 0], sizes = [32, 8], strides = [1, 1]} : vector<32x96xf32> to vector<32x8xf32>
    %cst_36 = arith.constant 0.353553385 : f32
    %47 = vector.broadcast %cst_36 : f32 to vector<32x8xf32>
    %48 = arith.mulf %46, %47 : vector<32x8xf32>
    %49 = vector.extract_strided_slice %44 {offsets = [0, 32], sizes = [32, 8], strides = [1, 1]} : vector<32x96xf32> to vector<32x8xf32>
    %50 = vector.extract_strided_slice %44 {offsets = [0, 64], sizes = [32, 8], strides = [1, 1]} : vector<32x96xf32> to vector<32x8xf32>
    %cst_37 = arith.constant dense<0.000000e+00> : vector<32x32xf32>
    %51 = tpu.matmul %48, %49, %cst_37 {dimension_numbers = #tpu.dot_dimension_numbers<[1], [1], [0], [0], [0, 0, 1, 0], [], []>} : vector<32x8xf32>, vector<32x8xf32>, vector<32x32xf32> -> vector<32x32xf32>
    %52 = arith.addf %51, %12 : vector<32x32xf32>
    %cst_38 = arith.constant dense<0xFF800000> : vector<32xf32>
    %53 = vector.multi_reduction <maximumf>, %52, %cst_38 [1] : vector<32x32xf32> to vector<32xf32>
    %54 = vector.shape_cast %53 : vector<32xf32> to vector<32x1xf32>
    %55 = vector.broadcast %54 : vector<32x1xf32> to vector<32x32xf32>
    %56 = arith.subf %52, %55 : vector<32x32xf32>
    %57 = math.exp %56 : vector<32x32xf32>
    %cst_39 = arith.constant dense<0.000000e+00> : vector<32xf32>
    %58 = vector.multi_reduction <add>, %57, %cst_39 [1] : vector<32x32xf32> to vector<32xf32>
    %59 = vector.shape_cast %58 : vector<32xf32> to vector<32x1xf32>
    %60 = tpu.reciprocal %59 {approx = true} : vector<32x1xf32> -> vector<32x1xf32>
    %61 = vector.broadcast %60 : vector<32x1xf32> to vector<32x32xf32>
    %62 = arith.mulf %57, %61 : vector<32x32xf32>
    %cst_40 = arith.constant dense<0.000000e+00> : vector<32x8xf32>
    %63 = tpu.matmul %62, %50, %cst_40 {dimension_numbers = #tpu.dot_dimension_numbers<[1], [0], [0], [1], [0, 0, 1, 1], [], []>} : vector<32x32xf32>, vector<32x8xf32>, vector<32x8xf32> -> vector<32x8xf32>
    %64 = vector.extract_strided_slice %6 {offsets = [0, 0], sizes = [8, 32], strides = [1, 1]} : vector<32x32xf32> to vector<8x32xf32>
    %cst_41 = arith.constant dense<0.000000e+00> : vector<32x32xf32>
    %65 = tpu.matmul %63, %64, %cst_41 {dimension_numbers = #tpu.dot_dimension_numbers<[1], [0], [0], [1], [0, 0, 1, 1], [], []>} : vector<32x8xf32>, vector<8x32xf32>, vector<32x32xf32> -> vector<32x32xf32>
    %66 = arith.addf %45, %65 : vector<32x32xf32>
    %67 = vector.extract_strided_slice %44 {offsets = [0, 8], sizes = [32, 8], strides = [1, 1]} : vector<32x96xf32> to vector<32x8xf32>
    %cst_42 = arith.constant 0.353553385 : f32
    %68 = vector.broadcast %cst_42 : f32 to vector<32x8xf32>
    %69 = arith.mulf %67, %68 : vector<32x8xf32>
    %70 = vector.extract_strided_slice %44 {offsets = [0, 40], sizes = [32, 8], strides = [1, 1]} : vector<32x96xf32> to vector<32x8xf32>
    %71 = vector.extract_strided_slice %44 {offsets = [0, 72], sizes = [32, 8], strides = [1, 1]} : vector<32x96xf32> to vector<32x8xf32>
    %cst_43 = arith.constant dense<0.000000e+00> : vector<32x32xf32>
    %72 = tpu.matmul %69, %70, %cst_43 {dimension_numbers = #tpu.dot_dimension_numbers<[1], [1], [0], [0], [0, 0, 1, 0], [], []>} : vector<32x8xf32>, vector<32x8xf32>, vector<32x32xf32> -> vector<32x32xf32>
    %73 = arith.addf %72, %12 : vector<32x32xf32>
    %cst_44 = arith.constant dense<0xFF800000> : vector<32xf32>
    %74 = vector.multi_reduction <maximumf>, %73, %cst_44 [1] : vector<32x32xf32> to vector<32xf32>
    %75 = vector.shape_cast %74 : vector<32xf32> to vector<32x1xf32>
    %76 = vector.broadcast %75 : vector<32x1xf32> to vector<32x32xf32>
    %77 = arith.subf %73, %76 : vector<32x32xf32>
    %78 = math.exp %77 : vector<32x32xf32>
    %cst_45 = arith.constant dense<0.000000e+00> : vector<32xf32>
    %79 = vector.multi_reduction <add>, %78, %cst_45 [1] : vector<32x32xf32> to vector<32xf32>
    %80 = vector.shape_cast %79 : vector<32xf32> to vector<32x1xf32>
    %81 = tpu.reciprocal %80 {approx = true} : vector<32x1xf32> -> vector<32x1xf32>
    %82 = vector.broadcast %81 : vector<32x1xf32> to vector<32x32xf32>
    %83 = arith.mulf %78, %82 : vector<32x32xf32>
    %cst_46 = arith.constant dense<0.000000e+00> : vector<32x8xf32>
    %84 = tpu.matmul %83, %71, %cst_46 {dimension_numbers = #tpu.dot_dimension_numbers<[1], [0], [0], [1], [0, 0, 1, 1], [], []>} : vector<32x32xf32>, vector<32x8xf32>, vector<32x8xf32> -> vector<32x8xf32>
    %85 = vector.extract_strided_slice %6 {offsets = [8, 0], sizes = [8, 32], strides = [1, 1]} : vector<32x32xf32> to vector<8x32xf32>
    %cst_47 = arith.constant dense<0.000000e+00> : vector<32x32xf32>
    %86 = tpu.matmul %84, %85, %cst_47 {dimension_numbers = #tpu.dot_dimension_numbers<[1], [0], [0], [1], [0, 0, 1, 1], [], []>} : vector<32x8xf32>, vector<8x32xf32>, vector<32x32xf32> -> vector<32x32xf32>
    %87 = arith.addf %66, %86 : vector<32x32xf32>
    %88 = vector.extract_strided_slice %44 {offsets = [0, 16], sizes = [32, 8], strides = [1, 1]} : vector<32x96xf32> to vector<32x8xf32>
    %cst_48 = arith.constant 0.353553385 : f32
    %89 = vector.broadcast %cst_48 : f32 to vector<32x8xf32>
    %90 = arith.mulf %88, %89 : vector<32x8xf32>
    %91 = vector.extract_strided_slice %44 {offsets = [0, 48], sizes = [32, 8], strides = [1, 1]} : vector<32x96xf32> to vector<32x8xf32>
    %92 = vector.extract_strided_slice %44 {offsets = [0, 80], sizes = [32, 8], strides = [1, 1]} : vector<32x96xf32> to vector<32x8xf32>
    %cst_49 = arith.constant dense<0.000000e+00> : vector<32x32xf32>
    %93 = tpu.matmul %90, %91, %cst_49 {dimension_numbers = #tpu.dot_dimension_numbers<[1], [1], [0], [0], [0, 0, 1, 0], [], []>} : vector<32x8xf32>, vector<32x8xf32>, vector<32x32xf32> -> vector<32x32xf32>
    %94 = arith.addf %93, %12 : vector<32x32xf32>
    %cst_50 = arith.constant dense<0xFF800000> : vector<32xf32>
    %95 = vector.multi_reduction <maximumf>, %94, %cst_50 [1] : vector<32x32xf32> to vector<32xf32>
    %96 = vector.shape_cast %95 : vector<32xf32> to vector<32x1xf32>
    %97 = vector.broadcast %96 : vector<32x1xf32> to vector<32x32xf32>
    %98 = arith.subf %94, %97 : vector<32x32xf32>
    %99 = math.exp %98 : vector<32x32xf32>
    %cst_51 = arith.constant dense<0.000000e+00> : vector<32xf32>
    %100 = vector.multi_reduction <add>, %99, %cst_51 [1] : vector<32x32xf32> to vector<32xf32>
    %101 = vector.shape_cast %100 : vector<32xf32> to vector<32x1xf32>
    %102 = tpu.reciprocal %101 {approx = true} : vector<32x1xf32> -> vector<32x1xf32>
    %103 = vector.broadcast %102 : vector<32x1xf32> to vector<32x32xf32>
    %104 = arith.mulf %99, %103 : vector<32x32xf32>
    %cst_52 = arith.constant dense<0.000000e+00> : vector<32x8xf32>
    %105 = tpu.matmul %104, %92, %cst_52 {dimension_numbers = #tpu.dot_dimension_numbers<[1], [0], [0], [1], [0, 0, 1, 1], [], []>} : vector<32x32xf32>, vector<32x8xf32>, vector<32x8xf32> -> vector<32x8xf32>
    %106 = vector.extract_strided_slice %6 {offsets = [16, 0], sizes = [8, 32], strides = [1, 1]} : vector<32x32xf32> to vector<8x32xf32>
    %cst_53 = arith.constant dense<0.000000e+00> : vector<32x32xf32>
    %107 = tpu.matmul %105, %106, %cst_53 {dimension_numbers = #tpu.dot_dimension_numbers<[1], [0], [0], [1], [0, 0, 1, 1], [], []>} : vector<32x8xf32>, vector<8x32xf32>, vector<32x32xf32> -> vector<32x32xf32>
    %108 = arith.addf %87, %107 : vector<32x32xf32>
    %109 = vector.extract_strided_slice %44 {offsets = [0, 24], sizes = [32, 8], strides = [1, 1]} : vector<32x96xf32> to vector<32x8xf32>
    %cst_54 = arith.constant 0.353553385 : f32
    %110 = vector.broadcast %cst_54 : f32 to vector<32x8xf32>
    %111 = arith.mulf %109, %110 : vector<32x8xf32>
    %112 = vector.extract_strided_slice %44 {offsets = [0, 56], sizes = [32, 8], strides = [1, 1]} : vector<32x96xf32> to vector<32x8xf32>
    %113 = vector.extract_strided_slice %44 {offsets = [0, 88], sizes = [32, 8], strides = [1, 1]} : vector<32x96xf32> to vector<32x8xf32>
    %cst_55 = arith.constant dense<0.000000e+00> : vector<32x32xf32>
    %114 = tpu.matmul %111, %112, %cst_55 {dimension_numbers = #tpu.dot_dimension_numbers<[1], [1], [0], [0], [0, 0, 1, 0], [], []>} : vector<32x8xf32>, vector<32x8xf32>, vector<32x32xf32> -> vector<32x32xf32>
    %115 = arith.addf %114, %12 : vector<32x32xf32>
    %cst_56 = arith.constant dense<0xFF800000> : vector<32xf32>
    %116 = vector.multi_reduction <maximumf>, %115, %cst_56 [1] : vector<32x32xf32> to vector<32xf32>
    %117 = vector.shape_cast %116 : vector<32xf32> to vector<32x1xf32>
    %118 = vector.broadcast %117 : vector<32x1xf32> to vector<32x32xf32>
    %119 = arith.subf %115, %118 : vector<32x32xf32>
    %120 = math.exp %119 : vector<32x32xf32>
    %cst_57 = arith.constant dense<0.000000e+00> : vector<32xf32>
    %121 = vector.multi_reduction <add>, %120, %cst_57 [1] : vector<32x32xf32> to vector<32xf32>
    %122 = vector.shape_cast %121 : vector<32xf32> to vector<32x1xf32>
    %123 = tpu.reciprocal %122 {approx = true} : vector<32x1xf32> -> vector<32x1xf32>
    %124 = vector.broadcast %123 : vector<32x1xf32> to vector<32x32xf32>
    %125 = arith.mulf %120, %124 : vector<32x32xf32>
    %cst_58 = arith.constant dense<0.000000e+00> : vector<32x8xf32>
    %126 = tpu.matmul %125, %113, %cst_58 {dimension_numbers = #tpu.dot_dimension_numbers<[1], [0], [0], [1], [0, 0, 1, 1], [], []>} : vector<32x32xf32>, vector<32x8xf32>, vector<32x8xf32> -> vector<32x8xf32>
    %127 = vector.extract_strided_slice %6 {offsets = [24, 0], sizes = [8, 32], strides = [1, 1]} : vector<32x32xf32> to vector<8x32xf32>
    %cst_59 = arith.constant dense<0.000000e+00> : vector<32x32xf32>
    %128 = tpu.matmul %126, %127, %cst_59 {dimension_numbers = #tpu.dot_dimension_numbers<[1], [0], [0], [1], [0, 0, 1, 1], [], []>} : vector<32x8xf32>, vector<8x32xf32>, vector<32x32xf32> -> vector<32x32xf32>
    %129 = arith.addf %108, %128 : vector<32x32xf32>
    %130 = vector.broadcast %7 : vector<1x32xf32> to vector<32x32xf32>
    %131 = arith.addf %129, %130 : vector<32x32xf32>
    %132 = arith.addf %131, %19 : vector<32x32xf32>
    %cst_60 = arith.constant dense<0.000000e+00> : vector<32xf32>
    %133 = vector.multi_reduction <add>, %132, %cst_60 [1] : vector<32x32xf32> to vector<32xf32>
    %134 = vector.shape_cast %133 : vector<32xf32> to vector<32x1xf32>
    %cst_61 = arith.constant 3.200000e+01 : f32
    %135 = vector.broadcast %cst_61 : f32 to vector<32x1xf32>
    %136 = arith.divf %134, %135 : vector<32x1xf32>
    %137 = vector.broadcast %136 : vector<32x1xf32> to vector<32x32xf32>
    %138 = arith.subf %132, %137 : vector<32x32xf32>
    %139 = arith.mulf %138, %138 : vector<32x32xf32>
    %cst_62 = arith.constant dense<0.000000e+00> : vector<32xf32>
    %140 = vector.multi_reduction <add>, %139, %cst_62 [1] : vector<32x32xf32> to vector<32xf32>
    %141 = vector.shape_cast %140 : vector<32xf32> to vector<32x1xf32>
    %cst_63 = arith.constant 3.200000e+01 : f32
    %142 = vector.broadcast %cst_63 : f32 to vector<32x1xf32>
    %143 = arith.divf %141, %142 : vector<32x1xf32>
    %144 = vector.broadcast %136 : vector<32x1xf32> to vector<32x32xf32>
    %145 = arith.subf %132, %144 : vector<32x32xf32>
    %cst_64 = arith.constant 9.99999974E-6 : f32
    %146 = vector.broadcast %cst_64 : f32 to vector<32x1xf32>
    %147 = arith.addf %143, %146 : vector<32x1xf32>
    %148 = math.rsqrt %147 : vector<32x1xf32>
    %149 = vector.broadcast %148 : vector<32x1xf32> to vector<32x32xf32>
    %150 = arith.mulf %145, %149 : vector<32x32xf32>
    %151 = vector.broadcast %2 : vector<1x32xf32> to vector<32x32xf32>
    %152 = arith.mulf %150, %151 : vector<32x32xf32>
    %153 = vector.broadcast %3 : vector<1x32xf32> to vector<32x32xf32>
    %154 = arith.addf %152, %153 : vector<32x32xf32>
    %cst_65 = arith.constant dense<0.000000e+00> : vector<32x32xf32>
    %155 = tpu.matmul %154, %8, %cst_65 {dimension_numbers = #tpu.dot_dimension_numbers<[1], [0], [0], [1], [0, 0, 1, 1], [], []>} : vector<32x32xf32>, vector<32x32xf32>, vector<32x32xf32> -> vector<32x32xf32>
    %156 = vector.broadcast %9 : vector<1x32xf32> to vector<32x32xf32>
    %157 = arith.addf %155, %156 : vector<32x32xf32>
    %cst_66 = arith.constant 5.000000e-01 : f32
    %158 = vector.broadcast %cst_66 : f32 to vector<32x32xf32>
    %159 = arith.mulf %158, %157 : vector<32x32xf32>
    %cst_67 = arith.constant 0.707106769 : f32
    %160 = vector.broadcast %cst_67 : f32 to vector<32x32xf32>
    %161 = arith.mulf %157, %160 : vector<32x32xf32>
    %162 = math.erf %161 : vector<32x32xf32>
    %cst_68 = arith.constant 1.000000e+00 : f32
    %163 = vector.broadcast %cst_68 : f32 to vector<32x32xf32>
    %164 = arith.addf %163, %162 : vector<32x32xf32>
    %165 = arith.mulf %159, %164 : vector<32x32xf32>
    %cst_69 = arith.constant dense<0.000000e+00> : vector<32x32xf32>
    %166 = tpu.matmul %165, %10, %cst_69 {dimension_numbers = #tpu.dot_dimension_numbers<[1], [0], [0], [1], [0, 0, 1, 1], [], []>} : vector<32x32xf32>, vector<32x32xf32>, vector<32x32xf32> -> vector<32x32xf32>
    %167 = vector.broadcast %11 : vector<1x32xf32> to vector<32x32xf32>
    %168 = arith.addf %166, %167 : vector<32x32xf32>
    %169 = arith.addf %168, %132 : vector<32x32xf32>
    %170 = vector.extract_strided_slice %169 {offsets = [0, 0], sizes = [16, 32], strides = [1, 1]} : vector<32x32xf32> to vector<16x32xf32>
    %171 = tpu.transpose %170, [1, 0] : vector<16x32xf32> -> vector<32x16xf32>
    %c0_70 = arith.constant 0 : index
    %c0_71 = arith.constant 0 : index
    %c0_72 = arith.constant 0 : index
    %172 = vector.load %arg15[%c0_70, %c0_71, %c0_72] : memref<2x32x16xf32, #tpu.memory_space<vmem>>, vector<1x32x16xf32>
    %173 = vector.shape_cast %172 : vector<1x32x16xf32> to vector<32x16xf32>
    %174 = vector.shape_cast %171 : vector<32x16xf32> to vector<1x32x16xf32>
    tpu.vector_store %arg15[%c0_70, %c0_71, %c0_72], %174 {strides = array<i32>} : memref<2x32x16xf32, #tpu.memory_space<vmem>>, vector<1x32x16xf32>,
    %175 = vector.extract_strided_slice %169 {offsets = [16, 0], sizes = [16, 32], strides = [1, 1]} : vector<32x32xf32> to vector<16x32xf32>
    %176 = tpu.transpose %175, [1, 0] : vector<16x32xf32> -> vector<32x16xf32>
    %c1_73 = arith.constant 1 : index
    %c0_74 = arith.constant 0 : index
    %c0_75 = arith.constant 0 : index
    %177 = vector.load %arg15[%c1_73, %c0_74, %c0_75] : memref<2x32x16xf32, #tpu.memory_space<vmem>>, vector<1x32x16xf32>
    %178 = vector.shape_cast %177 : vector<1x32x16xf32> to vector<32x16xf32>
    %179 = vector.shape_cast %176 : vector<32x16xf32> to vector<1x32x16xf32>
    tpu.vector_store %arg15[%c1_73, %c0_74, %c0_75], %179 {strides = array<i32>} : memref<2x32x16xf32, #tpu.memory_space<vmem>>, vector<1x32x16xf32>,
    return
  }
  func.func @transform_0(%arg0: i32) -> (i32, i32, i32) {
    %c0_i32 = arith.constant 0 : i32
    %c0_i32_0 = arith.constant 0 : i32
    %c0_i32_1 = arith.constant 0 : i32
    %c0_i32_2 = arith.constant 0 : i32
    return %c0_i32, %c0_i32_0, %c0_i32_1 : i32, i32, i32
  }
  func.func @transform_1(%arg0: i32) -> (i32, i32) {
    %c0_i32 = arith.constant 0 : i32
    %c0_i32_0 = arith.constant 0 : i32
    %c0_i32_1 = arith.constant 0 : i32
    return %c0_i32, %c0_i32_0 : i32, i32
  }
  func.func @transform_2(%arg0: i32) -> (i32, i32) {
    %c0_i32 = arith.constant 0 : i32
    %c0_i32_0 = arith.constant 0 : i32
    %c0_i32_1 = arith.constant 0 : i32
    return %c0_i32, %c0_i32_0 : i32, i32
  }
  func.func @transform_3(%arg0: i32) -> (i32, i32) {
    %c0_i32 = arith.constant 0 : i32
    %c0_i32_0 = arith.constant 0 : i32
    %c0_i32_1 = arith.constant 0 : i32
    return %c0_i32, %c0_i32_0 : i32, i32
  }
  func.func @transform_4(%arg0: i32) -> (i32, i32) {
    %c0_i32 = arith.constant 0 : i32
    %c0_i32_0 = arith.constant 0 : i32
    %c0_i32_1 = arith.constant 0 : i32
    return %c0_i32, %c0_i32_0 : i32, i32
  }
  func.func @transform_5(%arg0: i32) -> (i32, i32) {
    %c0_i32 = arith.constant 0 : i32
    %c0_i32_0 = arith.constant 0 : i32
    %c0_i32_1 = arith.constant 0 : i32
    return %c0_i32, %c0_i32_0 : i32, i32
  }
  func.func @transform_6(%arg0: i32) -> (i32, i32) {
    %c0_i32 = arith.constant 0 : i32
    %c0_i32_0 = arith.constant 0 : i32
    %c0_i32_1 = arith.constant 0 : i32
    return %c0_i32, %c0_i32_0 : i32, i32
  }
  func.func @transform_7(%arg0: i32) -> (i32, i32) {
    %c0_i32 = arith.constant 0 : i32
    %c0_i32_0 = arith.constant 0 : i32
    %c0_i32_1 = arith.constant 0 : i32
    return %c0_i32, %c0_i32_0 : i32, i32
  }
  func.func @transform_8(%arg0: i32) -> (i32, i32) {
    %c0_i32 = arith.constant 0 : i32
    %c0_i32_0 = arith.constant 0 : i32
    %c0_i32_1 = arith.constant 0 : i32
    return %c0_i32, %c0_i32_0 : i32, i32
  }
  func.func @transform_9(%arg0: i32) -> (i32, i32) {
    %c0_i32 = arith.constant 0 : i32
    %c0_i32_0 = arith.constant 0 : i32
    %c0_i32_1 = arith.constant 0 : i32
    return %c0_i32, %c0_i32_0 : i32, i32
  }
  func.func @transform_10(%arg0: i32) -> (i32, i32) {
    %c0_i32 = arith.constant 0 : i32
    %c0_i32_0 = arith.constant 0 : i32
    %c0_i32_1 = arith.constant 0 : i32
    return %c0_i32, %c0_i32_0 : i32, i32
  }
  func.func @transform_11(%arg0: i32) -> (i32, i32) {
    %c0_i32 = arith.constant 0 : i32
    %c0_i32_0 = arith.constant 0 : i32
    %c0_i32_1 = arith.constant 0 : i32
    return %c0_i32, %c0_i32_0 : i32, i32
  }
  func.func @transform_12(%arg0: i32) -> (i32, i32) {
    %c0_i32 = arith.constant 0 : i32
    %c0_i32_0 = arith.constant 0 : i32
    %c0_i32_1 = arith.constant 0 : i32
    return %c0_i32, %c0_i32_0 : i32, i32
  }
  func.func @transform_13(%arg0: i32) -> (i32, i32) {
    %c0_i32 = arith.constant 0 : i32
    %c0_i32_0 = arith.constant 0 : i32
    %c0_i32_1 = arith.constant 0 : i32
    return %c0_i32, %c0_i32_0 : i32, i32
  }
  func.func @transform_14(%arg0: i32) -> (i32, i32, i32) {
    %c0_i32 = arith.constant 0 : i32
    %c0_i32_0 = arith.constant 0 : i32
    %c0_i32_1 = arith.constant 0 : i32
    %c0_i32_2 = arith.constant 0 : i32
    return %c0_i32, %c0_i32_0, %c0_i32_1 : i32, i32, i32
  }
}

</mosaic_0001>

<bundles_post_ra>
// kernel: eq.8
= control target key start
LH: loop header
LB: loop body
LE: loop exit
PB: predicated region body
PF: predicated region fallthrough
CT: control target
= control target key end

     0   :  { %vm7_vm0 = vcmask 130048   ;;  %vm13_vm1 = vcmask 261248   ;;  %s39_s0 = inlined_call_operand.vmem [shape: s32[2,16], index: 0, kind: input, shape index: {}]   ;;  %s40_s1 = inlined_call_operand.vmem [shape: s32[32], index: 1, kind: output, shape index: {}]  }
   0x1   :  { %v4_v0 = vld [vmem:[%s39_s0] sm:$0x3]  ;;  %s22_s0 = smov 16  }
   0x2   :  { %5 = vst [vmem:[#allocation1] sm:$0x3] %v4_v0 }
   0x9   :  { %v10_v1 = vld [vmem:[#allocation1 + $0x1] sm:$0x1]   ;;  %v6_v2 = vld [vmem:[#allocation1] sm:$0x1]  }
   0xa   :  { %11 = vrot.lane.b32.xlu0 %v10_v1, %s22_s0  ;;  %8 = vst.msk [vmem:[#allocation0] sm:$0x1] %vm7_vm0, %v6_v2  }
  0x7c   :  { %v12_v3 = vpop.permute.xlu0 %11  }
  0x7d   :  { %14 = vst.msk [vmem:[#allocation0] sm:$0x1] %vm13_vm1, %v12_v3  }
  0x84   :  { %v18_v4 = vld [vmem:[#allocation0] sm:$0x1] }
  0x85   :  { %20 = vst [vmem:[%s40_s1] sm:$0x1] %v18_v4 }

// kernel: sa_wrapper_forward.1
= control target key start
LH: loop header
LB: loop body
LE: loop exit
PB: predicated region body
PF: predicated region fallthrough
CT: control target
= control target key end

     0   :  { %19 = vsyncpa [#allocation3], 0  ;;  %s3650_s0 = inlined_call_operand.vmem [shape: f32[2,32,16], index: 0, kind: input, shape index: {}]   ;;  %s3651_s1 = inlined_call_operand.vmem [shape: f32[32,32], index: 1, kind: input, shape index: {}]   ;;  %s3652_s2 = inlined_call_operand.vmem [shape: f32[1,32], index: 2, kind: input, shape index: {}]   ;;  %s3653_s3 = inlined_call_operand.hbm [shape: f32[1,32], index: 3, kind: input, shape index: {}]   ;;  %s3654_s4 = inlined_call_operand.vmem [shape: f32[32,96], index: 4, kind: input, shape index: {}]   ;;  %s3655_s5 = inlined_call_operand.hbm [shape: f32[1,96], index: 5, kind: input, shape index: {}]   ;;  %s3656_s6 = inlined_call_operand.vmem [shape: f32[32,32], index: 6, kind: input, shape index: {}]   ;;  %s3657_s7 = inlined_call_operand.hbm [shape: f32[1,32], index: 7, kind: input, shape index: {}]   ;;  %s3658_s8 = inlined_call_operand.vmem [shape: f32[1,32], index: 8, kind: input, shape index: {}]   ;;  %s3659_s9 = inlined_call_operand.vmem [shape: f32[1,32], index: 9, kind: input, shape index: {}]   ;;  %s3660_s10 = inlined_call_operand.vmem [shape: f32[32,32], index: 10, kind: input, shape index: {}]   ;;  %s3661_s11 = inlined_call_operand.hbm [shape: f32[1,32], index: 11, kind: input, shape index: {}]   ;;  %s3662_s12 = inlined_call_operand.vmem [shape: f32[32,32], index: 12, kind: input, shape index: {}]   ;;  %s3663_s13 = inlined_call_operand.hbm [shape: f32[1,32], index: 13, kind: input, shape index: {}]   ;;  %s3664_s14 = inlined_call_operand.vmem [shape: f32[2,32,16], index: 14, kind: output, shape index: {}]  }
   0x1   :  { %20 = vsyncpa [#allocation5], 0 }
   0x2   :  { %21 = vsyncpa [#allocation8], 0  ;;  %s3068_s29 = smov [#allocation4]   ;;  %s3069_s15 = smov [#allocation7]  }
   0x3   :  { %s46_s30 = sshll.u32 %s3068_s29, 4  ;;  %s74_s16 = sshll.u32 %s3069_s15, 4  ;;  %s47_s30 = int_to_ptr.vmem [resolvable:$true] %s46_s30  ;;  %s75_s16 = int_to_ptr.vmem [resolvable:$true] %s74_s16 }
   0x4   :  { %s2952_s19 = scalar_lea.hbm %s3655_s5, 16 }
   0x5   :  { %p2953_p0 = scmp.ne.s32.totalorder %s3655_s5, %s2952_s19  ;;  %p2956_p1 = scmp.lt.u32.totalorder %s2952_s19, %s3655_s5 }
   0x7   :  { %p2958_p2 = pnand %p2956_p1, %p2953_p0 }
   0x9   :  { %2961 = shalt.err (!%p2958_p2)
}
   0xa   :  { %s2962_s24 = scalar_lea.vmem %s47_s30, 16  ;;  %s2966_s25 = scalar_lea.vmem %s47_s30, 32 }
   0xb   :  { %p2963_p3 = scmp.ne.s32.totalorder %s47_s30, %s2962_s24  ;;  %p2967_p4 = scmp.lt.s32.totalorder %s47_s30, %s47_s30 }
   0xc   :  { %p2968_p5 = scmp.lt.s32.totalorder %s2966_s25, %s2962_s24 }
   0xe   :  { %p2969_p6 = por %p2968_p5, %p2967_p4 }
  0x10   :  { %p2970_p7 = pnand %p2969_p6, %p2963_p3 }
  0x12   :  { %2973 = shalt.err (!%p2970_p7)
}
  0x13   :  { %49 = dma.hbm_to_vmem [thread:$0]  %s3655_s5, 16, %s47_s30, [#allocation5]  }
  0x14   :  { %s2974_s15 = scalar_lea.hbm %s3661_s11, 16 }
  0x15   :  { %p2975_p8 = scmp.ne.s32.totalorder %s3661_s11, %s2974_s15  ;;  %p2978_p9 = scmp.lt.u32.totalorder %s2974_s15, %s3661_s11 }
  0x17   :  { %p2980_p10 = pnand %p2978_p9, %p2975_p8 }
  0x19   :  { %2983 = shalt.err (!%p2980_p10)
}
  0x1a   :  { %s2984_s21 = scalar_lea.vmem %s75_s16, 16  ;;  %s2988_s22 = scalar_lea.vmem %s75_s16, 32 }
  0x1b   :  { %p2985_p11 = scmp.ne.s32.totalorder %s75_s16, %s2984_s21  ;;  %p2989_p12 = scmp.lt.s32.totalorder %s75_s16, %s75_s16 }
  0x1c   :  { %p2990_p13 = scmp.lt.s32.totalorder %s2988_s22, %s2984_s21 }
  0x1e   :  { %p2991_p0 = por %p2990_p13, %p2989_p12 }
  0x20   :  { %p2992_p1 = pnand %p2991_p0, %p2985_p11 }
  0x22   :  { %2995 = shalt.err (!%p2992_p1)
}
  0x23   :  { %77 = dma.hbm_to_vmem [thread:$0]  %s3661_s11, 16, %s75_s16, [#allocation8]  }
  0x24   :  { %s3070_s23 = smov [#allocation2]   ;;  %s3071_s25 = smov [#allocation6]  }
  0x25   :  { %s34_s24 = sshll.u32 %s3070_s23, 4  ;;  %s58_s26 = sshll.u32 %s3071_s25, 4  ;;  %s35_s24 = int_to_ptr.vmem [resolvable:$true] %s34_s24  ;;  %s59_s26 = int_to_ptr.vmem [resolvable:$true] %s58_s26 }
  0x26   :  { %s2996_s29 = scalar_lea.hbm %s3653_s3, 16 }
  0x27   :  { %p2997_p2 = scmp.ne.s32.totalorder %s3653_s3, %s2996_s29  ;;  %p3000_p3 = scmp.lt.u32.totalorder %s2996_s29, %s3653_s3 }
  0x29   :  { %p3002_p4 = pnand %p3000_p3, %p2997_p2 }
  0x2b   :  { %3005 = shalt.err (!%p3002_p4)
}
  0x2c   :  { %s3006_s11 = scalar_lea.vmem %s35_s24, 16  ;;  %s3010_s16 = scalar_lea.vmem %s35_s24, 32 }
  0x2d   :  { %p3007_p5 = scmp.ne.s32.totalorder %s35_s24, %s3006_s11  ;;  %p3011_p6 = scmp.lt.s32.totalorder %s35_s24, %s35_s24 }
  0x2e   :  { %p3012_p7 = scmp.lt.s32.totalorder %s3010_s16, %s3006_s11 }
  0x30   :  { %p3013_p8 = por %p3012_p7, %p3011_p6 }
  0x32   :  { %p3014_p9 = pnand %p3013_p8, %p3007_p5 }
  0x34   :  { %3017 = shalt.err (!%p3014_p9)
}
  0x35   :  { %37 = dma.hbm_to_vmem [thread:$0]  %s3653_s3, 16, %s35_s24, [#allocation3]  }
  0x36   :  { %s3018_s30 = scalar_lea.hbm %s3657_s7, 16 }
  0x37   :  { %p3019_p10 = scmp.ne.s32.totalorder %s3657_s7, %s3018_s30  ;;  %p3022_p11 = scmp.lt.u32.totalorder %s3018_s30, %s3657_s7 }
  0x39   :  { %p3024_p12 = pnand %p3022_p11, %p3019_p10 }
  0x3b   :  { %3027 = shalt.err (!%p3024_p12)
}
  0x3c   :  { %s3028_s29 = scalar_lea.vmem %s59_s26, 16  ;;  %s3032_s15 = scalar_lea.vmem %s59_s26, 32 }
  0x3d   :  { %p3029_p13 = scmp.ne.s32.totalorder %s59_s26, %s3028_s29  ;;  %p3033_p0 = scmp.lt.s32.totalorder %s59_s26, %s59_s26 }
  0x3e   :  { %p3034_p1 = scmp.lt.s32.totalorder %s3032_s15, %s3028_s29 }
  0x40   :  { %p3035_p2 = por %p3034_p1, %p3033_p0 }
  0x42   :  { %p3036_p3 = pnand %p3035_p2, %p3029_p13 }
  0x44   :  { %3039 = shalt.err (!%p3036_p3)
}
  0x45   :  { %61 = dma.hbm_to_vmem [thread:$0]  %s3657_s7, 16, %s59_s26, [#allocation5]  }
  0x46   :  { %s3072_s17 = smov [#allocation9]   ;;  %s3040_s16 = scalar_lea.hbm %s3663_s13, 16 }
  0x47   :  { %s86_s18 = sshll.u32 %s3072_s17, 4  ;;  %p3041_p4 = scmp.ne.s32.totalorder %s3663_s13, %s3040_s16  ;;  %s87_s18 = int_to_ptr.vmem [resolvable:$true] %s86_s18 }
  0x48   :  { %p3044_p5 = scmp.lt.u32.totalorder %s3040_s16, %s3663_s13 }
  0x4a   :  { %p3046_p6 = pnand %p3044_p5, %p3041_p4 }
  0x4c   :  { %3049 = shalt.err (!%p3046_p6)
}
  0x4d   :  { %s3050_s30 = scalar_lea.vmem %s87_s18, 16  ;;  %s3054_s7 = scalar_lea.vmem %s87_s18, 32 }
  0x4e   :  { %p3051_p7 = scmp.ne.s32.totalorder %s87_s18, %s3050_s30  ;;  %p3055_p8 = scmp.lt.s32.totalorder %s87_s18, %s87_s18 }
  0x4f   :  { %p3056_p9 = scmp.lt.s32.totalorder %s3054_s7, %s3050_s30 }
  0x51   :  { %p3057_p10 = por %p3056_p9, %p3055_p8 }
  0x53   :  { %p3058_p11 = pnand %p3057_p10, %p3051_p7 }
  0x55   :  { %3061 = shalt.err (!%p3058_p11)
}
  0x56   :  { %89 = dma.hbm_to_vmem [thread:$0]  %s3663_s13, 16, %s87_s18, [#allocation8]  }
  0x57   :  { %3062 = dma.done.wait [#allocation3], 16  }
  0x58   :  { %3063 = vsyncadd [#allocation3], 4294967280 }
  0x59   :  { %3064 = dma.done.wait [#allocation5], 32  }
  0x5a   :  { %3065 = vsyncadd [#allocation5], 4294967264 }
  0x5b   :  { %3066 = dma.done.wait [#allocation8], 32  }
  0x5c   :  { %3067 = vsyncadd [#allocation8], 4294967264  ;;  %v133_v0 = vld [vmem:[%s3650_s0] sm:$0xff]  ;;  %v134_v2 = vld [vmem:[%s3650_s0 + $0x8] sm:$0xff]  ;;  %vm206_vm0 = vcmask 261120   ;;  %vm399_vm1 = vcmask 64512  }
  0x5d   :  { %v2261_v1 = vld [vmem:[%s3650_s0 + $0x20] sm:$0xff]  ;;  %137 = vxpose.xlu0.b32.start [1/4] (short) (narrow) %v133_v0, 16  ;;  %v2262_v3 = vld [vmem:[%s3650_s0 + $0x28] sm:$0xff]  ;;  %v135_v4 = vld [vmem:[%s3650_s0 + $0x10] sm:$0xff]  ;;  %s3074_s11 = smov 64   ;;  %s3076_s16 = smov 120  }
  0x5e   :  { %174 = vxpose.xlu1.b32.start [1/4] (short) (narrow) %v2261_v1, 16  ;;  %v2263_v5 = vld [vmem:[%s3650_s0 + $0x30] sm:$0xff]  ;;  %v136_v6 = vld [vmem:[%s3650_s0 + $0x18] sm:$0xff]  ;;  %v109_v36 = vld [vmem:[%s3654_s4] sm:$0xff]  ;;  %s3077_s20 = smov 80   ;;  %s3078_s21 = smov 112  }
  0x5f   :  { %v2264_v7 = vld [vmem:[%s3650_s0 + $0x38] sm:$0xff]  ;;  %v110_v37 = vld [vmem:[%s3654_s4 + $0x8] sm:$0xff]  ;;  %v111_v39 = vld [vmem:[%s3654_s4 + $0x10] sm:$0xff]  ;;  %s3079_s22 = smov 56   ;;  %s3080_s0 = smov 72   ;;  %vm2212_vm3 = vcmask 130048  }
  0x60   :  { %v2647_v38 = vpack.c.bf16 %v110_v37, %v109_v36  ;;  %v112_v40 = vld [vmem:[%s3654_s4 + $0x18] sm:$0xff]  ;;  %v2265_v55 = vld [vmem:[%s3652_s2] ss:$0 sm:$0xff]  ;;  %s3073_s2 = smov 96   ;;  %vm3298_vm2 = vmpackc.low %vm399_vm1, %vm399_vm1  ;;  %s3081_s5 = smov 104  }
  0x61   :  { %138 = vxpose.xlu0.b32.cont [2/4] (short) (narrow) %v134_v2, 16  ;;  %v2651_v41 = vpack.c.bf16 %v112_v40, %v111_v39  ;;  %v2266_v57 = vld [vmem:[#allocation2] ss:$0 sm:$0xff]  ;;  %v3325_v36 = vld [vmem:[%s3651_s1 + $0x8] sm:$0xff]  ;;  %s3082_s26 = smov 48   ;;  %s3083_s28 = smov 40  }
  0x62   :  { %175 = vxpose.xlu1.b32.cont [2/4] (short) (narrow) %v2262_v3, 16  ;;  %2648 = vmatprep.subr.bf16.mxu0 %v2647_v38  ;;  %v3330_v37 = vld [vmem:[%s3651_s1] sm:$0xff] }
  0x63   :  { %2650 = vmatpush3.bf16.msra.mxu0 %v2647_v38 }
  0x64   :  { %2652 = vmatprep.subr.bf16.mxu0 %v2651_v41 }
  0x65   :  { %139 = vxpose.xlu0.b32.cont [3/4] (short) (narrow) %v135_v4, 16 }
  0x66   :  { %176 = vxpose.xlu1.b32.cont [3/4] (short) (narrow) %v2263_v5, 16 }
  0x67   :  { %2654 = vmatpush3.bf16.msra.mxu0 %v2651_v41 }
  0x69   :  { %140 = vxpose.xlu0.b32.end [4/4] (short) (narrow) %v136_v6, 16 }
  0x6a   :  { %177 = vxpose.xlu1.b32.end [4/4] (short) (narrow) %v2264_v7, 16 }
  0xdd   :  { %v3243_v8 = vpop.trf.xlu0 }
  0xde   :  { %v207_v9 = vsel %vm206_vm0, %v3243_v8, 0.0  ;;  %v3247_v10 = vpop.trf.xlu1 }
  0xdf   :  { %208 = vadd.xlane.f32.xlu0 %v207_v9  ;;  %v213_v13 = vsel %vm206_vm0, %v3247_v10, 0.0  ;;  %v2267_v9 = vld [vmem:[#allocation4] ss:$0 sm:$0xff] }
  0xe1   :  { %v3249_v11 = vpop.trf.xlu0 }
  0xe2   :  { %v210_v12 = vsel %vm206_vm0, %v3249_v11, 0.0  ;;  %v3255_v14 = vpop.trf.xlu1 }
  0xe3   :  { %211 = vadd.xlane.f32.xlu1 %v210_v12  ;;  %v216_v15 = vsel %vm206_vm0, %v3255_v14, 0.0 }
  0xe7   :  { %214 = vadd.xlane.f32.xlu1 %v213_v13 }
  0xeb   :  { %217 = vadd.xlane.f32.xlu1 %v216_v15 }
 0x16c   :  { %v209_v16 = vpop.xlane.xlu0 %208 }
 0x16d   :  { %v220_v17 = vmul.f32 0.03125, %v209_v16 }
 0x16f   :  { %v224_v18 = vsub.f32 %v3243_v8, %v220_v17 }
 0x170   :  { %v212_v19 = vpop.xlane.xlu1 %211 }
 0x171   :  { %v221_v20 = vmul.f32 0.03125, %v212_v19  ;;  %v228_v21 = vmul.f32 %v224_v18, %v224_v18 }
 0x173   :  { %v225_v22 = vsub.f32 %v3249_v11, %v221_v20  ;;  %v232_v23 = vsel %vm206_vm0, %v228_v21, 0.0 }
 0x174   :  { %v215_v24 = vpop.xlane.xlu1 %214  ;;  %233 = vadd.xlane.f32.xlu0 %v232_v23 }
 0x175   :  { %v222_v25 = vmul.f32 0.03125, %v215_v24  ;;  %v229_v26 = vmul.f32 %v225_v22, %v225_v22 }
 0x177   :  { %v226_v27 = vsub.f32 %v3247_v10, %v222_v25  ;;  %v235_v28 = vsel %vm206_vm0, %v229_v26, 0.0 }
 0x178   :  { %236 = vadd.xlane.f32.xlu1 %v235_v28  ;;  %v218_v29 = vpop.xlane.xlu1 %217 }
 0x179   :  { %v223_v30 = vmul.f32 0.03125, %v218_v29  ;;  %v230_v31 = vmul.f32 %v226_v27, %v226_v27 }
 0x17b   :  { %v227_v32 = vsub.f32 %v3255_v14, %v223_v30  ;;  %v238_v33 = vsel %vm206_vm0, %v230_v31, 0.0 }
 0x17c   :  { %239 = vadd.xlane.f32.xlu0 %v238_v33 }
 0x17d   :  { %v231_v34 = vmul.f32 %v227_v32, %v227_v32 }
 0x17f   :  { %v241_v35 = vsel %vm206_vm0, %v231_v34, 0.0 }
 0x180   :  { %242 = vadd.xlane.f32.xlu1 %v241_v35 }
 0x201   :  { %v234_v42 = vpop.xlane.xlu0 %233 }
 0x202   :  { %v244_v43 = vmul.f32 0.03125, %v234_v42  ;;  %v3337_v42 = vld [vmem:[%s3651_s1 + $0x18] sm:$0xff] }
 0x204   :  { %v248_v44 = vadd.f32 1e-05, %v244_v43 }
 0x205   :  { %v237_v45 = vpop.xlane.xlu1 %236 }
 0x206   :  { %2864 = vrsqrt.f32 %v248_v44  ;;  %v245_v46 = vmul.f32 0.03125, %v237_v45  ;;  %v3343_v44 = vld [vmem:[%s3651_s1 + $0x10] sm:$0xff]  ;;  %s3075_s1 = smov 88  }
 0x208   :  { %v249_v47 = vadd.f32 1e-05, %v245_v46 }
 0x209   :  { %v240_v48 = vpop.xlane.xlu0 %239 }
 0x20a   :  { %2866 = vrsqrt.f32 %v249_v47  ;;  %v246_v49 = vmul.f32 0.03125, %v240_v48 }
 0x20c   :  { %v250_v50 = vadd.f32 1e-05, %v246_v49 }
 0x20d   :  { %v243_v51 = vpop.xlane.xlu1 %242 }
 0x20e   :  { %2868 = vrsqrt.f32 %v250_v50  ;;  %v247_v52 = vmul.f32 0.03125, %v243_v51 }
 0x210   :  { %v2865_v53 = vpop.eup %2864  ;;  %v251_v54 = vadd.f32 1e-05, %v247_v52 }
 0x211   :  { %v256_v56 = vmul.f32 %v2865_v53, %v224_v18 }
 0x212   :  { %2870 = vrsqrt.f32 %v251_v54 }
 0x213   :  { %v266_v58 = vmul.f32 %v2265_v55, %v256_v56 }
 0x214   :  { %v2867_v59 = vpop.eup %2866 }
 0x215   :  { %v276_v60 = vadd.f32 %v2266_v57, %v266_v58  ;;  %v257_v61 = vmul.f32 %v2867_v59, %v225_v22 }
 0x217   :  { %2469 = vmatprep.mubr.msk.f32.mxu0 %vm206_vm0, %v276_v60  ;;  %v267_v62 = vmul.f32 %v2265_v55, %v257_v61 }
 0x218   :  { %v2869_v63 = vpop.eup %2868 }
 0x219   :  { %v277_v0 = vadd.f32 %v2266_v57, %v267_v62  ;;  %v258_v1 = vmul.f32 %v2869_v63, %v226_v27 }
 0x21b   :  { %2470 = vmatmul.mubr.msk.f32.vlgmr.msra.gmra.mrb[0].mxu0 %vm206_vm0, %v277_v0  ;;  %v268_v2 = vmul.f32 %v2265_v55, %v258_v1 }
 0x21c   :  { %v2871_v3 = vpop.eup %2870 }
 0x21d   :  { %v278_v4 = vadd.f32 %v2266_v57, %v268_v2  ;;  %v259_v5 = vmul.f32 %v2871_v3, %v227_v32 }
 0x21f   :  { %2472 = vmatprep.mubr.msk.f32.mxu0 %vm206_vm0, %v278_v4  ;;  %v269_v6 = vmul.f32 %v2265_v55, %v259_v5 }
 0x221   :  { %v279_v7 = vadd.f32 %v2266_v57, %v269_v6 }
 0x223   :  { %2473 = vmatmul.mubr.msk.f32.gmra.mrb[2].mxu0 %vm206_vm0, %v279_v7 }
 0x2ee   :  { %v2471_v12 = vpop.f32.mrb[0].mxu0 }
 0x2ef   :  { %v370_v13 = vadd.f32 %v2471_v12, %v2267_v9  ;;  %v364_v15 = vpop.f32.mrb[1].mxu0 }
 0x2f0   :  { %v365_v16 = vadd.f32 %v2267_v9, %v364_v15 }
 0x2f1   :  { %v3310_v33 = vmul.f32 0.35355338, %v370_v13 }
 0x2f2   :  { %v3286_v17 = vpack.i.bf16 %v370_v13, %v365_v16  ;;  %v3288_v18 = vmul.f32 0.35355338, %v365_v16 }
 0x2f4   :  { %2785 = vrot.lane.b32.xlu0 %v3286_v17, %s3073_s2  ;;  %2483 = vmatprep.mubr.msk.f32.mxu1 %vm399_vm1, %v3288_v18 }
 0x2f6   :  { %v2474_v19 = vpop.f32.mrb[2].mxu0 }
 0x2f7   :  { %v380_v20 = vadd.f32 %v2474_v19, %v2267_v9  ;;  %v374_v21 = vpop.f32.mrb[3].mxu0 }
 0x2f8   :  { %v375_v22 = vadd.f32 %v2267_v9, %v374_v21 }
 0x2f9   :  { %v3318_v35 = vmul.f32 0.35355338, %v380_v20 }
 0x2fa   :  { %v3293_v23 = vpack.i.bf16 %v380_v20, %v375_v22  ;;  %v3312_v34 = vmul.f32 0.35355338, %v375_v22 }
 0x2fc   :  { %2790 = vrot.lane.b32.xlu1 %v3293_v23, %s3073_s2 }
 0x366   :  { %v2786_v24 = vpop.permute.xlu0 %2785 }
 0x367   :  { %v2788_v25 = vunpack.i.h.bf16 %v2786_v24  ;;  %v2787_v26 = vunpack.i.l.bf16 %v2786_v24 }
 0x369   :  { %v2655_v28 = vpack.c.bf16 %v2788_v25, %v2787_v26 }
 0x36b   :  { %2657 = vmatprep.subr.msk.bf16.mxu1 %vm3298_vm2, %v2655_v28 }
 0x36c   :  { %2660 = vmatpush3.bf16.xpose.msk.msra.mxu1 %vm3298_vm2, %v2655_v28 }
 0x36e   :  { %v2791_v29 = vpop.permute.xlu1 %2790 }
 0x36f   :  { %v2793_v30 = vunpack.i.h.bf16 %v2791_v29  ;;  %v2792_v31 = vunpack.i.l.bf16 %v2791_v29 }
 0x371   :  { %v2661_v32 = vpack.c.bf16 %v2793_v30, %v2792_v31 }
 0x373   :  { %2663 = vmatprep.subr.msk.bf16.mxu1 %vm3298_vm2, %v2661_v32 }
 0x374   :  { %2666 = vmatpush3.bf16.xpose.msk.msra.mxu1 %vm3298_vm2, %v2661_v32 }
 0x37b   :  { %2484 = vmatmul.mubr.msk.f32.vlgmr.msra.gmra.mrb[0].mxu1 %vm399_vm1, %v3310_v33 }
 0x37c   :  { %2486 = vmatprep.mubr.msk.f32.mxu1 %vm399_vm1, %v3312_v34 }
 0x37f   :  { %2487 = vmatmul.mubr.msk.f32.gmra.mrb[2].mxu1 %vm399_vm1, %v3318_v35 }
 0x44e   :  { %v2485_v38 = vpop.f32.mrb[0].mxu1 }
 0x44f   :  { %v492_v39 = vadd.f32 %v2485_v38, %v3325_v36  ;;  %v486_v40 = vpop.f32.mrb[1].mxu1 }
 0x450   :  { %v487_v41 = vadd.f32 %v486_v40, %v3330_v37 }
 0x451   :  { %v508_v43 = vsel %vm206_vm0, %v492_v39, -inf }
 0x452   :  { %509 = vmax.xlane.f32.xlu0 %v508_v43  ;;  %v2488_v45 = vpop.f32.mrb[2].mxu1  ;;  %v505_v46 = vsel %vm206_vm0, %v487_v41, -inf }
 0x453   :  { %v502_v47 = vadd.f32 %v2488_v45, %v3337_v42  ;;  %v496_v48 = vpop.f32.mrb[3].mxu1  ;;  %506 = vmax.xlane.f32.xlu1 %v505_v46 }
 0x454   :  { %v497_v49 = vadd.f32 %v496_v48, %v3343_v44 }
 0x455   :  { %v514_v50 = vsel %vm206_vm0, %v502_v47, -inf }
 0x456   :  { %v511_v51 = vsel %vm206_vm0, %v497_v49, -inf }
 0x457   :  { %512 = vmax.xlane.f32.xlu0 %v511_v51  ;;  %515 = vmax.xlane.f32.xlu1 %v514_v50 }
 0x468   :  { %2800 = vrot.lane.b32.xlu1 %v3293_v23, %s3074_s11 }
 0x46d   :  { %2795 = vrot.lane.b32.xlu0 %v3286_v17, %s3074_s11 }
 0x4df   :  { %v510_v52 = vpop.xlane.xlu0 %509 }
 0x4e0   :  { %v518_v53 = vsub.f32 %v492_v39, %v510_v52  ;;  %v507_v54 = vpop.xlane.xlu1 %506 }
 0x4e1   :  { %v517_v55 = vsub.f32 %v487_v41, %v507_v54 }
 0x4e2   :  { %v523_v56 = vmul.f32 1.442695, %v518_v53 }
 0x4e3   :  { %v521_v57 = vmul.f32 1.442695, %v517_v55 }
 0x4e4   :  { %2872 = vpow2.f32 %v523_v56  ;;  %v513_v58 = vpop.xlane.xlu0 %512  ;;  %v516_v59 = vpop.xlane.xlu1 %515 }
 0x4e5   :  { %2874 = vpow2.f32 %v521_v57  ;;  %v519_v60 = vsub.f32 %v497_v49, %v513_v58  ;;  %v520_v16 = vsub.f32 %v502_v47, %v516_v59 }
 0x4e7   :  { %v525_v61 = vmul.f32 1.442695, %v519_v60  ;;  %v527_v19 = vmul.f32 1.442695, %v520_v16 }
 0x4e8   :  { %v2796_v62 = vpop.permute.xlu0 %2795  ;;  %v2801_v63 = vpop.permute.xlu1 %2800 }
 0x4e9   :  { %2876 = vpow2.f32 %v525_v61  ;;  %v2798_v0 = vunpack.i.h.bf16 %v2796_v62  ;;  %v2797_v1 = vunpack.i.l.bf16 %v2796_v62  ;;  %v2803_v2 = vunpack.i.h.bf16 %v2801_v63 }
 0x4ea   :  { %v2802_v3 = vunpack.i.l.bf16 %v2801_v63  ;;  %2878 = vpow2.f32 %v527_v19 }
 0x4eb   :  { %v2667_v4 = vpack.c.bf16 %v2798_v0, %v2797_v1 }
 0x4ec   :  { %v2671_v5 = vpack.c.bf16 %v2803_v2, %v2802_v3 }
 0x4ed   :  { %2668 = vmatprep.subr.bf16.mxu0 %v2667_v4 }
 0x4ee   :  { %v2873_v6 = vpop.eup %2872  ;;  %2670 = vmatpush3.bf16.msra.mxu0 %v2667_v4 }
 0x4ef   :  { %v2875_v7 = vpop.eup %2874  ;;  %2672 = vmatprep.subr.bf16.mxu0 %v2671_v5  ;;  %v532_v9 = vsel %vm206_vm0, %v2873_v6, 0.0 }
 0x4f0   :  { %533 = vadd.xlane.f32.xlu1 %v532_v9  ;;  %v529_v12 = vsel %vm206_vm0, %v2875_v7, 0.0 }
 0x4f1   :  { %530 = vadd.xlane.f32.xlu0 %v529_v12 }
 0x4f2   :  { %2674 = vmatpush3.bf16.msra.mxu0 %v2671_v5 }
 0x4f3   :  { %v2877_v13 = vpop.eup %2876 }
 0x4f4   :  { %v535_v15 = vsel %vm206_vm0, %v2877_v13, 0.0  ;;  %v2879_v20 = vpop.eup %2878 }
 0x4f5   :  { %536 = vadd.xlane.f32.xlu0 %v535_v15  ;;  %v538_v21 = vsel %vm206_vm0, %v2879_v20, 0.0 }
 0x501   :  { %2805 = vrot.lane.b32.xlu1 %v3286_v17, %s3075_s1 }
 0x50b   :  { %2810 = vrot.lane.b32.xlu0 %v3293_v23, %s3075_s1 }
 0x50f   :  { %660 = vrot.lane.b32.xlu0 %v3310_v33, %s3076_s16 }
 0x513   :  { %664 = vrot.lane.b32.xlu0 %v3318_v35, %s3076_s16 }
 0x517   :  { %2820 = vrot.lane.b32.xlu0 %v3293_v23, %s3077_s20 }
 0x51b   :  { %1124 = vrot.lane.b32.xlu0 %v3310_v33, %s3078_s21 }
 0x51f   :  { %1128 = vrot.lane.b32.xlu0 %v3318_v35, %s3078_s21 }
 0x525   :  { %539 = vadd.xlane.f32.xlu1 %v538_v21 }
 0x536   :  { %658 = vrot.lane.b32.xlu1 %v3288_v18, %s3076_s16 }
 0x53a   :  { %662 = vrot.lane.b32.xlu1 %v3312_v34, %s3076_s16 }
 0x53e   :  { %2815 = vrot.lane.b32.xlu1 %v3286_v17, %s3077_s20 }
 0x542   :  { %1122 = vrot.lane.b32.xlu1 %v3288_v18, %s3078_s21 }
 0x546   :  { %1126 = vrot.lane.b32.xlu1 %v3312_v34, %s3078_s21 }
 0x57d   :  { %v534_v22 = vpop.xlane.xlu1 %533 }
 0x57e   :  { %2880 = vrcp.f32 %v534_v22  ;;  %v531_v24 = vpop.xlane.xlu0 %530 }
 0x57f   :  { %2882 = vrcp.f32 %v531_v24 }
 0x581   :  { %v2806_v25 = vpop.permute.xlu1 %2805 }
 0x582   :  { %v2808_v26 = vunpack.i.h.bf16 %v2806_v25  ;;  %v2807_v28 = vunpack.i.l.bf16 %v2806_v25  ;;  %v537_v29 = vpop.xlane.xlu0 %536 }
 0x583   :  { %2884 = vrcp.f32 %v537_v29 }
 0x584   :  { %v2675_v30 = vpack.c.bf16 %v2808_v26, %v2807_v28 }
 0x586   :  { %v2811_v31 = vpop.permute.xlu0 %2810  ;;  %2677 = vmatprep.subr.msk.bf16.mxu0 %vm3298_vm2, %v2675_v30 }
 0x587   :  { %v2813_v39 = vunpack.i.h.bf16 %v2811_v31  ;;  %v2812_v40 = vunpack.i.l.bf16 %v2811_v31 }
 0x588   :  { %v2881_v32 = vpop.eup %2880 }
 0x589   :  { %v2883_v38 = vpop.eup %2882  ;;  %v546_v43 = vmul.f32 %v2881_v32, %v2873_v6  ;;  %v2681_v46 = vpack.c.bf16 %v2813_v39, %v2812_v40 }
 0x58a   :  { %v545_v41 = vmul.f32 %v2883_v38, %v2875_v7  ;;  %v661_v48 = vpop.permute.xlu0 %660 }
 0x58c   :  { %2497 = vmatprep.mubr.msk.f32.mxu0 %vm206_vm0, %v545_v41 }
 0x58d   :  { %v2885_v45 = vpop.eup %2884  ;;  %2498 = vmatmul.mubr.msk.f32.vlgmr.msra.gmra.mrb[4].mxu0 %vm206_vm0, %v546_v43 }
 0x58e   :  { %2680 = vmatpush3.bf16.xpose.msk.msra.mxu0 %vm3298_vm2, %v2675_v30  ;;  %v547_v47 = vmul.f32 %v2885_v45, %v2877_v13  ;;  %v665_v51 = vpop.permute.xlu0 %664 }
 0x58f   :  { %2683 = vmatprep.subr.msk.bf16.mxu0 %vm3298_vm2, %v2681_v46 }
 0x590   :  { %2500 = vmatprep.mubr.msk.f32.mxu0 %vm206_vm0, %v547_v47 }
 0x592   :  { %v2821_v54 = vpop.permute.xlu0 %2820 }
 0x593   :  { %v2823_v59 = vunpack.i.h.bf16 %v2821_v54  ;;  %v2822_v60 = vunpack.i.l.bf16 %v2821_v54 }
 0x595   :  { %v2701_v62 = vpack.c.bf16 %v2823_v59, %v2822_v60 }
 0x596   :  { %2686 = vmatpush3.bf16.xpose.msk.msra.mxu0 %vm3298_vm2, %v2681_v46  ;;  %v1125_v0 = vpop.permute.xlu0 %1124 }
 0x59a   :  { %v1129_v2 = vpop.permute.xlu0 %1128 }
 0x5b2   :  { %v540_v49 = vpop.xlane.xlu1 %539 }
 0x5b3   :  { %2886 = vrcp.f32 %v540_v49 }
 0x5b6   :  { %v659_v50 = vpop.permute.xlu1 %658 }
 0x5ba   :  { %v663_v52 = vpop.permute.xlu1 %662 }
 0x5bd   :  { %v2887_v53 = vpop.eup %2886 }
 0x5be   :  { %v2816_v55 = vpop.permute.xlu1 %2815  ;;  %v548_v56 = vmul.f32 %v2887_v53, %v2879_v20 }
 0x5bf   :  { %v2818_v57 = vunpack.i.h.bf16 %v2816_v55  ;;  %v2817_v58 = vunpack.i.l.bf16 %v2816_v55 }
 0x5c0   :  { %2501 = vmatmul.mubr.msk.f32.gmra.mrb[6].mxu0 %vm206_vm0, %v548_v56 }
 0x5c1   :  { %v2695_v61 = vpack.c.bf16 %v2818_v57, %v2817_v58  ;;  %2511 = vmatprep.mubr.msk.f32.mxu0 %vm399_vm1, %v659_v50 }
 0x5c2   :  { %v1123_v63 = vpop.permute.xlu1 %1122 }
 0x5c3   :  { %2697 = vmatprep.subr.msk.bf16.mxu0 %vm3298_vm2, %v2695_v61 }
 0x5c4   :  { %2512 = vmatmul.mubr.msk.f32.vlgmr.msra.gmra.mrb[8].mxu0 %vm399_vm1, %v661_v48 }
 0x5c5   :  { %2700 = vmatpush3.bf16.xpose.msk.msra.mxu0 %vm3298_vm2, %v2695_v61  ;;  %2514 = vmatprep.mubr.msk.f32.mxu0 %vm399_vm1, %v663_v52 }
 0x5c6   :  { %2703 = vmatprep.subr.msk.bf16.mxu0 %vm3298_vm2, %v2701_v62  ;;  %v1127_v1 = vpop.permute.xlu1 %1126 }
 0x5c8   :  { %2515 = vmatmul.mubr.msk.f32.gmra.mrb[10].mxu0 %vm399_vm1, %v665_v51 }
 0x5c9   :  { %2555 = vmatprep.mubr.msk.f32.mxu0 %vm399_vm1, %v1123_v63 }
 0x5cd   :  { %2706 = vmatpush3.bf16.xpose.msk.msra.mxu0 %vm3298_vm2, %v2701_v62 }
 0x5d4   :  { %2556 = vmatmul.mubr.msk.f32.vlgmr.msra.gmra.mrb[12].mxu0 %vm399_vm1, %v1125_v0 }
 0x5d5   :  { %2558 = vmatprep.mubr.msk.f32.mxu0 %vm399_vm1, %v1127_v1 }
 0x5d8   :  { %2559 = vmatmul.mubr.msk.f32.gmra.mrb[14].mxu0 %vm399_vm1, %v1129_v2 }
 0x660   :  { %v3396_v3 = vpop.f32.mrb[4].mxu0 }
 0x661   :  { %v3398_v4 = vpop.f32.mrb[5].mxu0 }
 0x693   :  { %v3400_v5 = vpop.f32.mrb[6].mxu0 }
 0x694   :  { %v3402_v6 = vpop.f32.mrb[7].mxu0 }
 0x697   :  { %v2513_v7 = vpop.f32.mrb[8].mxu0 }
 0x698   :  { %v762_v9 = vadd.f32 %v2513_v7, %v3325_v36  ;;  %v756_v12 = vpop.f32.mrb[9].mxu0 }
 0x699   :  { %v757_v13 = vadd.f32 %v756_v12, %v3330_v37 }
 0x69a   :  { %v778_v15 = vsel %vm206_vm0, %v762_v9, -inf }
 0x69b   :  { %779 = vmax.xlane.f32.xlu0 %v778_v15  ;;  %v2516_v16 = vpop.f32.mrb[10].mxu0  ;;  %v775_v19 = vsel %vm206_vm0, %v757_v13, -inf }
 0x69c   :  { %v772_v20 = vadd.f32 %v2516_v16, %v3337_v42  ;;  %v766_v21 = vpop.f32.mrb[11].mxu0  ;;  %776 = vmax.xlane.f32.xlu1 %v775_v19 }
 0x69d   :  { %v767_v22 = vadd.f32 %v766_v21, %v3343_v44 }
 0x69e   :  { %v784_v24 = vsel %vm206_vm0, %v772_v20, -inf }
 0x69f   :  { %v781_v25 = vsel %vm206_vm0, %v767_v22, -inf }
 0x6a0   :  { %782 = vmax.xlane.f32.xlu0 %v781_v25  ;;  %785 = vmax.xlane.f32.xlu1 %v784_v24 }
 0x6a7   :  { %v2557_v26 = vpop.f32.mrb[12].mxu0 }
 0x6a8   :  { %v1220_v28 = vpop.f32.mrb[13].mxu0  ;;  %v3434_v58 = vadd.f32 %v2557_v26, %v3325_v36 }
 0x6a9   :  { %v3437_v59 = vadd.f32 %v1220_v28, %v3330_v37 }
 0x6ab   :  { %v2560_v29 = vpop.f32.mrb[14].mxu0 }
 0x6ac   :  { %v1230_v30 = vpop.f32.mrb[15].mxu0  ;;  %v3445_v61 = vadd.f32 %v2560_v29, %v3337_v42 }
 0x6ad   :  { %v3440_v60 = vadd.f32 %v1230_v30, %v3343_v44 }
 0x728   :  { %v780_v31 = vpop.xlane.xlu0 %779 }
 0x729   :  { %v788_v32 = vsub.f32 %v762_v9, %v780_v31  ;;  %v777_v38 = vpop.xlane.xlu1 %776 }
 0x72a   :  { %v787_v39 = vsub.f32 %v757_v13, %v777_v38 }
 0x72b   :  { %v793_v40 = vmul.f32 1.442695, %v788_v32 }
 0x72c   :  { %v791_v41 = vmul.f32 1.442695, %v787_v39 }
 0x72d   :  { %2888 = vpow2.f32 %v793_v40  ;;  %v783_v43 = vpop.xlane.xlu0 %782  ;;  %v786_v45 = vpop.xlane.xlu1 %785 }
 0x72e   :  { %2890 = vpow2.f32 %v791_v41  ;;  %v789_v46 = vsub.f32 %v767_v22, %v783_v43  ;;  %v790_v47 = vsub.f32 %v772_v20, %v786_v45 }
 0x730   :  { %v795_v48 = vmul.f32 1.442695, %v789_v46  ;;  %v797_v49 = vmul.f32 1.442695, %v790_v47 }
 0x732   :  { %2892 = vpow2.f32 %v795_v48 }
 0x733   :  { %2894 = vpow2.f32 %v797_v49 }
 0x737   :  { %v3412_v50 = vpop.eup %2888 }
 0x738   :  { %v2891_v51 = vpop.eup %2890  ;;  %v802_v52 = vsel %vm206_vm0, %v3412_v50, 0.0 }
 0x739   :  { %803 = vadd.xlane.f32.xlu1 %v802_v52  ;;  %v799_v53 = vsel %vm206_vm0, %v2891_v51, 0.0 }
 0x73a   :  { %800 = vadd.xlane.f32.xlu0 %v799_v53 }
 0x73c   :  { %v3417_v54 = vpop.eup %2892 }
 0x73d   :  { %v3419_v55 = vpop.eup %2894  ;;  %v805_v56 = vsel %vm206_vm0, %v3417_v54, 0.0 }
 0x73e   :  { %806 = vadd.xlane.f32.xlu0 %v805_v56  ;;  %v808_v57 = vsel %vm206_vm0, %v3419_v55, 0.0 }
 0x73f   :  { %809 = vadd.xlane.f32.xlu1 %v808_v57 }
 0x750   :  { %2830 = vrot.lane.b32.xlu1 %v3293_v23, %s3079_s22 }
 0x754   :  { %2835 = vrot.lane.b32.xlu1 %v3286_v17, %s3080_s0  ;;  %2825 = vrot.lane.b32.xlu0 %v3286_v17, %s3079_s22 }
 0x758   :  { %1493 = vrot.lane.b32.xlu1 %v3288_v18, %s3081_s5  ;;  %2840 = vrot.lane.b32.xlu0 %v3293_v23, %s3080_s0  ;;  %v1242_v18 = vsel %vm206_vm0, %v3434_v58, -inf }
 0x75c   :  { %1497 = vrot.lane.b32.xlu1 %v3312_v34, %s3081_s5  ;;  %1495 = vrot.lane.b32.xlu0 %v3310_v33, %s3081_s5  ;;  %v1239_v33 = vsel %vm206_vm0, %v3437_v59, -inf  ;;  %v1245_v34 = vsel %vm206_vm0, %v3440_v60, -inf }
 0x760   :  { %1499 = vrot.lane.b32.xlu0 %v3318_v35, %s3081_s5  ;;  %v1248_v35 = vsel %vm206_vm0, %v3445_v61, -inf }
 0x77f   :  { %1243 = vmax.xlane.f32.xlu0 %v1242_v18 }
 0x780   :  { %1240 = vmax.xlane.f32.xlu1 %v1239_v33 }
 0x783   :  { %1246 = vmax.xlane.f32.xlu0 %v1245_v34 }
 0x784   :  { %1249 = vmax.xlane.f32.xlu1 %v1248_v35 }
 0x7c6   :  { %v804_v62 = vpop.xlane.xlu1 %803 }
 0x7c7   :  { %v801_v63 = vpop.xlane.xlu0 %800 }
 0x7c8   :  { %2896 = vrcp.f32 %v801_v63 }
 0x7c9   :  { %2898 = vrcp.f32 %v804_v62 }
 0x7cb   :  { %v807_v0 = vpop.xlane.xlu0 %806 }
 0x7cc   :  { %v810_v1 = vpop.xlane.xlu1 %809  ;;  %2900 = vrcp.f32 %v807_v0  ;;  %v115_v0 = vld [vmem:[%s3656_s6 + $0x8] sm:$0xff] }
 0x7cd   :  { %2902 = vrcp.f32 %v810_v1  ;;  %v114_v1 = vld [vmem:[%s3656_s6] sm:$0xff] }
 0x7cf   :  { %v2826_v2 = vpop.permute.xlu0 %2825 }
 0x7d0   :  { %v2828_v7 = vunpack.i.h.bf16 %v2826_v2  ;;  %v2827_v9 = vunpack.i.l.bf16 %v2826_v2  ;;  %v2831_v12 = vpop.permute.xlu1 %2830 }
 0x7d1   :  { %v2833_v13 = vunpack.i.h.bf16 %v2831_v12  ;;  %v2832_v15 = vunpack.i.l.bf16 %v2831_v12 }
 0x7d2   :  { %v2897_v16 = vpop.eup %2896  ;;  %v2687_v19 = vpack.c.bf16 %v2828_v7, %v2827_v9 }
 0x7d3   :  { %v2841_v20 = vpop.permute.xlu0 %2840  ;;  %v815_v21 = vmul.f32 %v2897_v16, %v2891_v51  ;;  %v2691_v22 = vpack.c.bf16 %v2833_v13, %v2832_v15  ;;  %v2899_v31 = vpop.eup %2898 }
 0x7d4   :  { %v2836_v24 = vpop.permute.xlu1 %2835  ;;  %2688 = vmatprep.subr.bf16.mxu1 %v2687_v19  ;;  %v2843_v25 = vunpack.i.h.bf16 %v2841_v20  ;;  %v2842_v26 = vunpack.i.l.bf16 %v2841_v20  ;;  %v816_v40 = vmul.f32 %v2899_v31, %v3412_v50 }
 0x7d5   :  { %v2838_v28 = vunpack.i.h.bf16 %v2836_v24  ;;  %v2837_v29 = vunpack.i.l.bf16 %v2836_v24  ;;  %2690 = vmatpush3.bf16.msra.mxu1 %v2687_v19  ;;  %2525 = vmatprep.mubr.msk.f32.mxu1 %vm206_vm0, %v815_v21 }
 0x7d6   :  { %2692 = vmatprep.subr.bf16.mxu1 %v2691_v22  ;;  %v2901_v38 = vpop.eup %2900  ;;  %v2721_v39 = vpack.c.bf16 %v2843_v25, %v2842_v26 }
 0x7d7   :  { %v2715_v30 = vpack.c.bf16 %v2838_v28, %v2837_v29  ;;  %v2903_v41 = vpop.eup %2902  ;;  %v817_v43 = vmul.f32 %v2901_v38, %v3417_v54  ;;  %v1496_v46 = vpop.permute.xlu0 %1495 }
 0x7d8   :  { %v1494_v32 = vpop.permute.xlu1 %1493  ;;  %v818_v45 = vmul.f32 %v2903_v41, %v3419_v55 }
 0x7d9   :  { %2717 = vmatprep.subr.msk.bf16.mxu0 %vm3298_vm2, %v2715_v30  ;;  %2591 = vmatprep.mubr.msk.f32.mxu0 %vm399_vm1, %v1494_v32 }
 0x7da   :  { %2694 = vmatpush3.bf16.msra.mxu1 %v2691_v22  ;;  %2720 = vmatpush3.bf16.xpose.msk.msra.mxu0 %vm3298_vm2, %v2715_v30 }
 0x7db   :  { %2723 = vmatprep.subr.msk.bf16.mxu0 %vm3298_vm2, %v2721_v39  ;;  %v1500_v48 = vpop.permute.xlu0 %1499  ;;  %2531 = vmatprep.subr.mxu1 %v115_v0 }
 0x7dc   :  { %v1498_v47 = vpop.permute.xlu1 %1497 }
 0x7dd   :  { %2526 = vmatmul.mubr.msk.f32.vlgmr.msra.gmra.mrb[4].mxu1 %vm206_vm0, %v816_v40 }
 0x7de   :  { %2528 = vmatprep.mubr.msk.f32.mxu1 %vm206_vm0, %v817_v43  ;;  %2532 = vmatpush3.msra.mxu1 %v115_v0 }
 0x7df   :  { %2539 = vmatprep.subr.mxu1 %v114_v1 }
 0x7e1   :  { %2529 = vmatmul.mubr.msk.f32.gmra.mrb[6].mxu1 %vm206_vm0, %v818_v45 }
 0x7e2   :  { %2726 = vmatpush3.bf16.xpose.msk.msra.mxu0 %vm3298_vm2, %v2721_v39 }
 0x7e9   :  { %2592 = vmatmul.mubr.msk.f32.vlgmr.msra.gmra.mrb[16].mxu0 %vm399_vm1, %v1496_v46 }
 0x7ea   :  { %2594 = vmatprep.mubr.msk.f32.mxu0 %vm399_vm1, %v1498_v47 }
 0x7ed   :  { %2595 = vmatmul.mubr.msk.f32.gmra.mrb[18].mxu0 %vm399_vm1, %v1500_v48 }
 0x80c   :  { %v1244_v49 = vpop.xlane.xlu0 %1243 }
 0x80d   :  { %v1252_v50 = vsub.f32 %v3434_v58, %v1244_v49  ;;  %v1241_v51 = vpop.xlane.xlu1 %1240 }
 0x80e   :  { %v1251_v52 = vsub.f32 %v3437_v59, %v1241_v51 }
 0x80f   :  { %v1257_v53 = vmul.f32 1.442695, %v1252_v50 }
 0x810   :  { %v1255_v54 = vmul.f32 1.442695, %v1251_v52  ;;  %v1247_v55 = vpop.xlane.xlu0 %1246 }
 0x811   :  { %2904 = vpow2.f32 %v1257_v53  ;;  %v1253_v27 = vsub.f32 %v3440_v60, %v1247_v55  ;;  %v1250_v56 = vpop.xlane.xlu1 %1249 }
 0x812   :  { %2906 = vpow2.f32 %v1255_v54  ;;  %v1254_v57 = vsub.f32 %v3445_v61, %v1250_v56 }
 0x813   :  { %v1259_v18 = vmul.f32 1.442695, %v1253_v27 }
 0x814   :  { %v1261_v33 = vmul.f32 1.442695, %v1254_v57 }
 0x815   :  { %2908 = vpow2.f32 %v1259_v18 }
 0x816   :  { %2910 = vpow2.f32 %v1261_v33 }
 0x81b   :  { %v3476_v34 = vpop.eup %2904 }
 0x81c   :  { %v2907_v58 = vpop.eup %2906  ;;  %v1266_v59 = vsel %vm206_vm0, %v3476_v34, 0.0 }
 0x81d   :  { %1267 = vadd.xlane.f32.xlu1 %v1266_v59  ;;  %v1263_v35 = vsel %vm206_vm0, %v2907_v58, 0.0 }
 0x81e   :  { %1264 = vadd.xlane.f32.xlu0 %v1263_v35 }
 0x81f   :  { %v3481_v62 = vpop.eup %2908 }
 0x820   :  { %v3483_v60 = vpop.eup %2910  ;;  %v1269_v61 = vsel %vm206_vm0, %v3481_v62, 0.0 }
 0x821   :  { %v1272_v63 = vsel %vm206_vm0, %v3483_v60, 0.0 }
 0x822   :  { %1270 = vadd.xlane.f32.xlu0 %v1269_v61  ;;  %1273 = vadd.xlane.f32.xlu1 %v1272_v63 }
 0x833   :  { %2850 = vrot.lane.b32.xlu1 %v3293_v23, %s3082_s26 }
 0x838   :  { %2845 = vrot.lane.b32.xlu0 %v3286_v17, %s3082_s26 }
 0x8aa   :  { %v1268_v2 = vpop.xlane.xlu1 %1267 }
 0x8ab   :  { %v1265_v7 = vpop.xlane.xlu0 %1264 }
 0x8ac   :  { %2912 = vrcp.f32 %v1265_v7 }
 0x8ad   :  { %2914 = vrcp.f32 %v1268_v2 }
 0x8af   :  { %v1271_v9 = vpop.xlane.xlu0 %1270  ;;  %v1274_v12 = vpop.xlane.xlu1 %1273 }
 0x8b0   :  { %v2527_v13 = vpop.f32.mrb[4].mxu1  ;;  %2916 = vrcp.f32 %v1271_v9 }
 0x8b1   :  { %v909_v15 = vpop.f32.mrb[5].mxu1  ;;  %2918 = vrcp.f32 %v1274_v12 }
 0x8b2   :  { %2533 = vmatprep.mubr.msk.f32.mxu1 %vm399_vm1, %v909_v15 }
 0x8b3   :  { %v2846_v16 = vpop.permute.xlu0 %2845  ;;  %2534 = vmatmul.mubr.msk.f32.vlgmr.msra.gmra.mrb[8].mxu1 %vm399_vm1, %v2527_v13  ;;  %v2851_v21 = vpop.permute.xlu1 %2850 }
 0x8b4   :  { %v2848_v19 = vunpack.i.h.bf16 %v2846_v16  ;;  %v2847_v20 = vunpack.i.l.bf16 %v2846_v16  ;;  %v2530_v22 = vpop.f32.mrb[6].mxu1  ;;  %2540 = vmatpush3.msra.mxu1 %v114_v1  ;;  %v2853_v26 = vunpack.i.h.bf16 %v2851_v21  ;;  %v2852_v28 = vunpack.i.l.bf16 %v2851_v21 }
 0x8b5   :  { %v919_v24 = vpop.f32.mrb[7].mxu1 }
 0x8b6   :  { %v2707_v25 = vpack.c.bf16 %v2848_v19, %v2847_v20  ;;  %2536 = vmatprep.mubr.msk.f32.mxu1 %vm399_vm1, %v919_v24  ;;  %v2711_v29 = vpack.c.bf16 %v2853_v26, %v2852_v28  ;;  %v2913_v30 = vpop.eup %2912 }
 0x8b7   :  { %2537 = vmatmul.mubr.msk.f32.gmra.mrb[10].mxu1 %vm399_vm1, %v2530_v22  ;;  %v2915_v39 = vpop.eup %2914 }
 0x8b8   :  { %2541 = vmatprep.mubr.msk.f32.mxu1 %vm399_vm1, %v3398_v4  ;;  %2708 = vmatprep.subr.bf16.mxu1 %v2707_v25  ;;  %v1280_v45 = vmul.f32 %v2915_v39, %v3476_v34 }
 0x8ba   :  { %v2917_v41 = vpop.eup %2916 }
 0x8bb   :  { %2542 = vmatmul.mubr.msk.f32.vlgmr.msra.gmra.mrb[8].mxu1 %vm399_vm1, %v3396_v3  ;;  %v1279_v3 = vmul.f32 %v2913_v30, %v2907_v58  ;;  %v117_v30 = vld [vmem:[%s3656_s6 + $0x18] sm:$0xff] }
 0x8bc   :  { %2710 = vmatpush3.bf16.msra.mxu1 %v2707_v25  ;;  %2544 = vmatprep.mubr.msk.f32.mxu1 %vm399_vm1, %v3402_v6  ;;  %v2593_v31 = vpop.f32.mrb[16].mxu0 }
 0x8bd   :  { %2712 = vmatprep.subr.bf16.mxu1 %v2711_v29  ;;  %v1597_v32 = vadd.f32 %v2593_v31, %v3325_v36  ;;  %v1591_v38 = vpop.f32.mrb[17].mxu0 }
 0x8be   :  { %v1592_v40 = vadd.f32 %v1591_v38, %v3330_v37  ;;  %v2919_v37 = vpop.eup %2918 }
 0x8bf   :  { %2545 = vmatmul.mubr.msk.f32.gmra.mrb[10].mxu1 %vm399_vm1, %v3400_v5  ;;  %v1613_v4 = vsel %vm206_vm0, %v1597_v32, -inf  ;;  %v1281_v5 = vmul.f32 %v2917_v41, %v3481_v62  ;;  %v1282_v50 = vmul.f32 %v2919_v37, %v3483_v60 }
 0x8c0   :  { %2714 = vmatpush3.bf16.msra.mxu1 %v2711_v29  ;;  %1614 = vmax.xlane.f32.xlu0 %v1613_v4  ;;  %v2596_v43 = vpop.f32.mrb[18].mxu0  ;;  %v1610_v6 = vsel %vm206_vm0, %v1592_v40, -inf }
 0x8c1   :  { %2569 = vmatprep.mubr.msk.f32.mxu1 %vm206_vm0, %v1279_v3  ;;  %v1607_v36 = vadd.f32 %v2596_v43, %v3337_v42  ;;  %v1601_v46 = vpop.f32.mrb[19].mxu0  ;;  %1611 = vmax.xlane.f32.xlu1 %v1610_v6  ;;  %v116_v42 = vld [vmem:[%s3656_s6 + $0x10] sm:$0xff]  ;;  %v2336_v6 = vld [vmem:[#allocation6] ss:$0 sm:$0xff] }
 0x8c2   :  { %v1602_v47 = vadd.f32 %v1601_v46, %v3343_v44  ;;  %2575 = vmatprep.subr.mxu1 %v116_v42 }
 0x8c3   :  { %2570 = vmatmul.mubr.msk.f32.vlgmr.msra.gmra.mrb[12].mxu1 %vm206_vm0, %v1280_v45  ;;  %v1619_v48 = vsel %vm206_vm0, %v1607_v36, -inf }
 0x8c4   :  { %2572 = vmatprep.mubr.msk.f32.mxu1 %vm206_vm0, %v1281_v5  ;;  %v1616_v49 = vsel %vm206_vm0, %v1602_v47, -inf  ;;  %2576 = vmatpush3.msra.mxu1 %v116_v42 }
 0x8c5   :  { %1617 = vmax.xlane.f32.xlu0 %v1616_v49  ;;  %1620 = vmax.xlane.f32.xlu1 %v1619_v48 }
 0x8c7   :  { %2573 = vmatmul.mubr.msk.f32.gmra.mrb[14].mxu1 %vm206_vm0, %v1282_v50 }
 0x94d   :  { %v1615_v44 = vpop.xlane.xlu0 %1614 }
 0x94e   :  { %v1623_v51 = vsub.f32 %v1597_v32, %v1615_v44  ;;  %v1612_v52 = vpop.xlane.xlu1 %1611 }
 0x94f   :  { %v1622_v53 = vsub.f32 %v1592_v40, %v1612_v52 }
 0x950   :  { %v1628_v54 = vmul.f32 1.442695, %v1623_v51 }
 0x951   :  { %v1626_v55 = vmul.f32 1.442695, %v1622_v53 }
 0x952   :  { %2920 = vpow2.f32 %v1628_v54  ;;  %v1618_v27 = vpop.xlane.xlu0 %1617  ;;  %v1621_v56 = vpop.xlane.xlu1 %1620 }
 0x953   :  { %2922 = vpow2.f32 %v1626_v55  ;;  %v1624_v57 = vsub.f32 %v1602_v47, %v1618_v27  ;;  %v1625_v18 = vsub.f32 %v1607_v36, %v1621_v56 }
 0x955   :  { %v1630_v33 = vmul.f32 1.442695, %v1624_v57  ;;  %v1632_v34 = vmul.f32 1.442695, %v1625_v18 }
 0x957   :  { %2924 = vpow2.f32 %v1630_v33 }
 0x958   :  { %2926 = vpow2.f32 %v1632_v34 }
 0x95c   :  { %v2921_v58 = vpop.eup %2920 }
 0x95d   :  { %v2923_v59 = vpop.eup %2922  ;;  %v1637_v35 = vsel %vm206_vm0, %v2921_v58, 0.0 }
 0x95e   :  { %1638 = vadd.xlane.f32.xlu1 %v1637_v35  ;;  %v1634_v62 = vsel %vm206_vm0, %v2923_v59, 0.0 }
 0x95f   :  { %1635 = vadd.xlane.f32.xlu0 %v1634_v62 }
 0x961   :  { %v2925_v60 = vpop.eup %2924 }
 0x962   :  { %v2927_v61 = vpop.eup %2926  ;;  %v1640_v63 = vsel %vm206_vm0, %v2925_v60, 0.0 }
 0x963   :  { %1641 = vadd.xlane.f32.xlu0 %v1640_v63  ;;  %v1643_v0 = vsel %vm206_vm0, %v2927_v61, 0.0 }
 0x964   :  { %1644 = vadd.xlane.f32.xlu1 %v1643_v0 }
 0x975   :  { %2860 = vrot.lane.b32.xlu1 %v3293_v23, %s3083_s28 }
 0x979   :  { %2855 = vrot.lane.b32.xlu0 %v3286_v17, %s3083_s28 }
 0x996   :  { %v2571_v1 = vpop.f32.mrb[12].mxu1 }
 0x997   :  { %v1373_v2 = vpop.f32.mrb[13].mxu1 }
 0x998   :  { %2577 = vmatprep.mubr.msk.f32.mxu1 %vm399_vm1, %v1373_v2 }
 0x999   :  { %2578 = vmatmul.mubr.msk.f32.vlgmr.msra.gmra.mrb[8].mxu1 %vm399_vm1, %v2571_v1 }
 0x99a   :  { %v2574_v7 = vpop.f32.mrb[14].mxu1 }
 0x99b   :  { %v1383_v9 = vpop.f32.mrb[15].mxu1 }
 0x99c   :  { %2580 = vmatprep.mubr.msk.f32.mxu1 %vm399_vm1, %v1383_v9  ;;  %v120_v9 = vld [vmem:[%s3660_s10 + $0x8] sm:$0xff] }
 0x99d   :  { %2581 = vmatmul.mubr.msk.f32.gmra.mrb[10].mxu1 %vm399_vm1, %v2574_v7  ;;  %v119_v7 = vld [vmem:[%s3660_s10] sm:$0xff] }
 0x9eb   :  { %v1639_v12 = vpop.xlane.xlu1 %1638 }
 0x9ec   :  { %v1636_v13 = vpop.xlane.xlu0 %1635 }
 0x9ed   :  { %2928 = vrcp.f32 %v1636_v13  ;;  %v121_v13 = vld [vmem:[%s3660_s10 + $0x10] sm:$0xff] }
 0x9ee   :  { %2930 = vrcp.f32 %v1639_v12  ;;  %v2735_v12 = vpack.c.bf16 %v120_v9, %v119_v7 }
 0x9f0   :  { %v1642_v15 = vpop.xlane.xlu0 %1641  ;;  %2736 = vmatprep.subr.bf16.mxu0 %v2735_v12 }
 0x9f1   :  { %v1645_v16 = vpop.xlane.xlu1 %1644  ;;  %2932 = vrcp.f32 %v1642_v15  ;;  %v122_v15 = vld [vmem:[%s3660_s10 + $0x18] sm:$0xff]  ;;  %2738 = vmatpush3.bf16.msra.mxu0 %v2735_v12 }
 0x9f2   :  { %2934 = vrcp.f32 %v1645_v16  ;;  %v2739_v16 = vpack.c.bf16 %v122_v15, %v121_v13 }
 0x9f4   :  { %v2856_v17 = vpop.permute.xlu0 %2855  ;;  %2740 = vmatprep.subr.bf16.mxu0 %v2739_v16 }
 0x9f5   :  { %v2858_v23 = vunpack.i.h.bf16 %v2856_v17  ;;  %v2857_v19 = vunpack.i.l.bf16 %v2856_v17  ;;  %v2861_v20 = vpop.permute.xlu1 %2860  ;;  %2742 = vmatpush3.bf16.msra.mxu0 %v2739_v16 }
 0x9f6   :  { %v2863_v21 = vunpack.i.h.bf16 %v2861_v20  ;;  %v2862_v22 = vunpack.i.l.bf16 %v2861_v20 }
 0x9f7   :  { %v2929_v24 = vpop.eup %2928  ;;  %v2727_v25 = vpack.c.bf16 %v2858_v23, %v2857_v19 }
 0x9f8   :  { %v1650_v26 = vmul.f32 %v2929_v24, %v2923_v59  ;;  %v2731_v28 = vpack.c.bf16 %v2863_v21, %v2862_v22  ;;  %v2931_v29 = vpop.eup %2930 }
 0x9f9   :  { %2728 = vmatprep.subr.bf16.mxu1 %v2727_v25  ;;  %v1651_v32 = vmul.f32 %v2931_v29, %v2921_v58 }
 0x9fa   :  { %2730 = vmatpush3.bf16.msra.mxu1 %v2727_v25  ;;  %2605 = vmatprep.mubr.msk.f32.mxu1 %vm206_vm0, %v1650_v26 }
 0x9fb   :  { %2732 = vmatprep.subr.bf16.mxu1 %v2731_v28  ;;  %v2933_v31 = vpop.eup %2932 }
 0x9fc   :  { %v2935_v38 = vpop.eup %2934  ;;  %v1652_v39 = vmul.f32 %v2933_v31, %v2925_v60 }
 0x9fd   :  { %v1653_v40 = vmul.f32 %v2935_v38, %v2927_v61 }
 0x9fe   :  { %2734 = vmatpush3.bf16.msra.mxu1 %v2731_v28 }
 0x9ff   :  { %2611 = vmatprep.subr.mxu1 %v117_v30 }
 0xa01   :  { %2606 = vmatmul.mubr.msk.f32.vlgmr.msra.gmra.mrb[16].mxu1 %vm206_vm0, %v1651_v32  ;;  %v2337_v32 = vld [vmem:[%s3658_s8] ss:$0 sm:$0xff] }
 0xa02   :  { %2608 = vmatprep.mubr.msk.f32.mxu1 %vm206_vm0, %v1652_v39  ;;  %2612 = vmatpush3.msra.mxu1 %v117_v30 }
 0xa05   :  { %2609 = vmatmul.mubr.msk.f32.gmra.mrb[18].mxu1 %vm206_vm0, %v1653_v40 }
 0xad4   :  { %v2607_v41 = vpop.f32.mrb[16].mxu1 }
 0xad5   :  { %v1744_v4 = vpop.f32.mrb[17].mxu1 }
 0xad6   :  { %2613 = vmatprep.mubr.msk.f32.mxu1 %vm399_vm1, %v1744_v4 }
 0xad7   :  { %2614 = vmatmul.mubr.msk.f32.vlgmr.msra.gmra.mrb[8].mxu1 %vm399_vm1, %v2607_v41  ;;  %v2338_v41 = vld [vmem:[%s3659_s9] ss:$0 sm:$0xff] }
 0xad8   :  { %v2610_v3 = vpop.f32.mrb[18].mxu1 }
 0xad9   :  { %v1754_v43 = vpop.f32.mrb[19].mxu1 }
 0xada   :  { %2616 = vmatprep.mubr.msk.f32.mxu1 %vm399_vm1, %v1754_v43 }
 0xadb   :  { %2617 = vmatmul.mubr.msk.f32.gmra.mrb[10].mxu1 %vm399_vm1, %v2610_v3 }
 0xbaa   :  { %v2615_v45 = vpop.f32.mrb[8].mxu1 }
 0xbab   :  { %v1871_v36 = vadd.f32 %v2615_v45, %v2336_v6  ;;  %v1841_v46 = vpop.f32.mrb[9].mxu1 }
 0xbac   :  { %v1870_v37 = vadd.f32 %v2336_v6, %v1841_v46 }
 0xbad   :  { %v3549_v47 = vadd.f32 %v1871_v36, %v3249_v11 }
 0xbae   :  { %v3552_v5 = vadd.f32 %v1870_v37, %v3243_v8  ;;  %v2618_v48 = vpop.f32.mrb[10].mxu1 }
 0xbaf   :  { %v1873_v49 = vadd.f32 %v2618_v48, %v2336_v6  ;;  %v1851_v50 = vpop.f32.mrb[11].mxu1  ;;  %v1881_v42 = vsel %vm206_vm0, %v3549_v47, 0.0 }
 0xbb0   :  { %v1872_v44 = vadd.f32 %v2336_v6, %v1851_v50  ;;  %1882 = vadd.xlane.f32.xlu0 %v1881_v42  ;;  %v1878_v51 = vsel %vm206_vm0, %v3552_v5, 0.0 }
 0xbb1   :  { %v3559_v52 = vadd.f32 %v1873_v49, %v3255_v14  ;;  %1879 = vadd.xlane.f32.xlu1 %v1878_v51  ;;  %v125_v51 = vld [vmem:[%s3662_s12 + $0x8] sm:$0xff] }
 0xbb2   :  { %v3562_v11 = vadd.f32 %v1872_v44, %v3247_v10  ;;  %v124_v44 = vld [vmem:[%s3662_s12] sm:$0xff] }
 0xbb3   :  { %v1887_v8 = vsel %vm206_vm0, %v3559_v52, 0.0 }
 0xbb4   :  { %v1884_v53 = vsel %vm206_vm0, %v3562_v11, 0.0 }
 0xbb5   :  { %1888 = vadd.xlane.f32.xlu1 %v1887_v8  ;;  %1885 = vadd.xlane.f32.xlu0 %v1884_v53  ;;  %v2743_v8 = vpack.c.bf16 %v125_v51, %v124_v44  ;;  %v126_v53 = vld [vmem:[%s3662_s12 + $0x10] sm:$0xff] }
 0xbb7   :  { %2744 = vmatprep.subr.bf16.mxu0 %v2743_v8  ;;  %2751 = vmatprep.subr.bf16.mxu1 %v2743_v8 }
 0xbb8   :  { %2753 = vmatpush3.bf16.msra.mxu1 %v2743_v8 }
 0xc3d   :  { %v1883_v54 = vpop.xlane.xlu0 %1882 }
 0xc3e   :  { %v1891_v55 = vmul.f32 0.03125, %v1883_v54  ;;  %v1880_v27 = vpop.xlane.xlu1 %1879  ;;  %v127_v54 = vld [vmem:[%s3662_s12 + $0x18] sm:$0xff] }
 0xc3f   :  { %v1890_v56 = vmul.f32 0.03125, %v1880_v27  ;;  %v2339_v27 = vld [vmem:[#allocation7] ss:$0 sm:$0xff] }
 0xc40   :  { %v1895_v57 = vsub.f32 %v3549_v47, %v1891_v55  ;;  %v2747_v55 = vpack.c.bf16 %v127_v54, %v126_v53 }
 0xc41   :  { %v1894_v14 = vsub.f32 %v3552_v5, %v1890_v56 }
 0xc42   :  { %v1889_v18 = vpop.xlane.xlu1 %1888  ;;  %v1886_v33 = vpop.xlane.xlu0 %1885  ;;  %v1899_v10 = vmul.f32 %v1895_v57, %v1895_v57  ;;  %2752 = vmatprep.subr.bf16.mxu1 %v2747_v55 }
 0xc43   :  { %v1893_v34 = vmul.f32 0.03125, %v1889_v18  ;;  %v1892_v58 = vmul.f32 0.03125, %v1886_v33  ;;  %v1898_v59 = vmul.f32 %v1894_v14, %v1894_v14  ;;  %2754 = vmatpush3.bf16.msra.mxu1 %v2747_v55 }
 0xc44   :  { %v1905_v35 = vsel %vm206_vm0, %v1899_v10, 0.0 }
 0xc45   :  { %v1897_v62 = vsub.f32 %v3559_v52, %v1893_v34  ;;  %v1896_v60 = vsub.f32 %v3562_v11, %v1892_v58  ;;  %1906 = vadd.xlane.f32.xlu1 %v1905_v35  ;;  %v1902_v61 = vsel %vm206_vm0, %v1898_v59, 0.0 }
 0xc46   :  { %1903 = vadd.xlane.f32.xlu0 %v1902_v61 }
 0xc47   :  { %v1901_v63 = vmul.f32 %v1897_v62, %v1897_v62  ;;  %v1900_v0 = vmul.f32 %v1896_v60, %v1896_v60 }
 0xc49   :  { %v1911_v1 = vsel %vm206_vm0, %v1901_v63, 0.0  ;;  %v1908_v2 = vsel %vm206_vm0, %v1900_v0, 0.0 }
 0xc4a   :  { %1912 = vadd.xlane.f32.xlu1 %v1911_v1  ;;  %1909 = vadd.xlane.f32.xlu0 %v1908_v2 }
 0xcd2   :  { %v1907_v17 = vpop.xlane.xlu1 %1906 }
 0xcd3   :  { %v1915_v23 = vmul.f32 0.03125, %v1907_v17  ;;  %v1904_v19 = vpop.xlane.xlu0 %1903 }
 0xcd4   :  { %v1914_v20 = vmul.f32 0.03125, %v1904_v19 }
 0xcd5   :  { %v1919_v21 = vadd.f32 1e-05, %v1915_v23 }
 0xcd6   :  { %v1918_v22 = vadd.f32 1e-05, %v1914_v20 }
 0xcd7   :  { %2936 = vrsqrt.f32 %v1919_v21  ;;  %v1913_v24 = vpop.xlane.xlu1 %1912  ;;  %v1910_v25 = vpop.xlane.xlu0 %1909 }
 0xcd8   :  { %2938 = vrsqrt.f32 %v1918_v22  ;;  %v1917_v26 = vmul.f32 0.03125, %v1913_v24  ;;  %v1916_v28 = vmul.f32 0.03125, %v1910_v25  ;;  %v2344_v22 = vld [vmem:[#allocation9] ss:$0 sm:$0xff] }
 0xcda   :  { %v1921_v29 = vadd.f32 1e-05, %v1917_v26  ;;  %v1920_v30 = vadd.f32 1e-05, %v1916_v28 }
 0xcdc   :  { %2940 = vrsqrt.f32 %v1921_v29 }
 0xcdd   :  { %2942 = vrsqrt.f32 %v1920_v30 }
 0xce1   :  { %v2937_v31 = vpop.eup %2936 }
 0xce2   :  { %v2939_v38 = vpop.eup %2938  ;;  %v1927_v39 = vmul.f32 %v2937_v31, %v1895_v57 }
 0xce3   :  { %v1926_v40 = vmul.f32 %v2939_v38, %v1894_v14 }
 0xce4   :  { %v1937_v4 = vmul.f32 %v2337_v32, %v1927_v39 }
 0xce5   :  { %v1936_v3 = vmul.f32 %v2337_v32, %v1926_v40 }
 0xce6   :  { %v2941_v43 = vpop.eup %2940  ;;  %v1947_v46 = vadd.f32 %v2338_v41, %v1937_v4 }
 0xce7   :  { %v2943_v6 = vpop.eup %2942  ;;  %v1946_v45 = vadd.f32 %v2338_v41, %v1936_v3  ;;  %v1929_v36 = vmul.f32 %v2941_v43, %v1897_v62 }
 0xce8   :  { %v1928_v37 = vmul.f32 %v2943_v6, %v1896_v60 }
 0xce9   :  { %2627 = vmatprep.mubr.msk.f32.mxu0 %vm206_vm0, %v1946_v45  ;;  %v1939_v48 = vmul.f32 %v2337_v32, %v1929_v36 }
 0xcea   :  { %2628 = vmatmul.mubr.msk.f32.vlgmr.msra.gmra.mrb[20].mxu0 %vm206_vm0, %v1947_v46  ;;  %v1938_v49 = vmul.f32 %v2337_v32, %v1928_v37 }
 0xceb   :  { %v1949_v50 = vadd.f32 %v2338_v41, %v1939_v48  ;;  %2746 = vmatpush3.bf16.msra.mxu0 %v2743_v8 }
 0xcec   :  { %v1948_v42 = vadd.f32 %v2338_v41, %v1938_v49  ;;  %2748 = vmatprep.subr.bf16.mxu0 %v2747_v55 }
 0xcee   :  { %2630 = vmatprep.mubr.msk.f32.mxu0 %vm206_vm0, %v1948_v42 }
 0xcef   :  { %2631 = vmatmul.mubr.msk.f32.gmra.mrb[22].mxu0 %vm206_vm0, %v1949_v50 }
 0xcf0   :  { %2750 = vmatpush3.bf16.msra.mxu0 %v2747_v55 }
 0xdbd   :  { %v2629_v56 = vpop.f32.mrb[20].mxu0 }
 0xdbe   :  { %v2040_v57 = vadd.f32 %v2629_v56, %v2339_v27  ;;  %v2034_v14 = vpop.f32.mrb[21].mxu0 }
 0xdbf   :  { %v2035_v18 = vadd.f32 %v2339_v27, %v2034_v14 }
 0xdc0   :  { %v2058_v33 = vmul.f32 0.70710677, %v2040_v57  ;;  %v2054_v7 = vmul.f32 0.5, %v2040_v57 }
 0xdc1   :  { %v2057_v10 = vmul.f32 0.70710677, %v2035_v18  ;;  %v2053_v1 = vmul.f32 0.5, %v2035_v18 }
 0xdc2   :  { %2944 = verf.f32 %v2058_v33  ;;  %v2632_v34 = vpop.f32.mrb[22].mxu0 }
 0xdc3   :  { %2946 = verf.f32 %v2057_v10  ;;  %v2050_v58 = vadd.f32 %v2632_v34, %v2339_v27  ;;  %v2044_v59 = vpop.f32.mrb[23].mxu0 }
 0xdc4   :  { %v2045_v35 = vadd.f32 %v2339_v27, %v2044_v59 }
 0xdc5   :  { %v2060_v62 = vmul.f32 0.70710677, %v2050_v58  ;;  %v2056_v19 = vmul.f32 0.5, %v2050_v58 }
 0xdc6   :  { %v2059_v60 = vmul.f32 0.70710677, %v2045_v35  ;;  %v2055_v17 = vmul.f32 0.5, %v2045_v35 }
 0xdc7   :  { %2948 = verf.f32 %v2060_v62 }
 0xdc8   :  { %2950 = verf.f32 %v2059_v60 }
 0xdcc   :  { %v2945_v61 = vpop.eup %2944 }
 0xdcd   :  { %v2947_v63 = vpop.eup %2946  ;;  %v2066_v0 = vadd.f32 1.0, %v2945_v61 }
 0xdce   :  { %v2065_v2 = vadd.f32 1.0, %v2947_v63 }
 0xdcf   :  { %v2070_v13 = vmul.f32 %v2066_v0, %v2054_v7 }
 0xdd0   :  { %v2069_v9 = vmul.f32 %v2065_v2, %v2053_v1 }
 0xdd1   :  { %v2949_v12 = vpop.eup %2948 }
 0xdd2   :  { %v2951_v15 = vpop.eup %2950  ;;  %v2068_v16 = vadd.f32 1.0, %v2949_v12  ;;  %2641 = vmatprep.mubr.msk.f32.mxu0 %vm206_vm0, %v2069_v9 }
 0xdd3   :  { %v2067_v23 = vadd.f32 1.0, %v2951_v15  ;;  %2642 = vmatmul.mubr.msk.f32.vlgmr.msra.gmra.mrb[24].mxu0 %vm206_vm0, %v2070_v13 }
 0xdd4   :  { %v2072_v21 = vmul.f32 %v2068_v16, %v2056_v19 }
 0xdd5   :  { %v2071_v20 = vmul.f32 %v2067_v23, %v2055_v17 }
 0xdd7   :  { %2644 = vmatprep.mubr.msk.f32.mxu1 %vm206_vm0, %v2071_v20 }
 0xdd8   :  { %2645 = vmatmul.mubr.msk.f32.vlgmr.msra.gmra.mrb[20].mxu1 %vm206_vm0, %v2072_v21 }
 0xea6   :  { %v2643_v24 = vpop.f32.mrb[24].mxu0 }
 0xea7   :  { %v2157_v25 = vpop.f32.mrb[25].mxu0  ;;  %v2163_v28 = vadd.f32 %v2643_v24, %v2344_v22 }
 0xea8   :  { %v2158_v26 = vadd.f32 %v2344_v22, %v2157_v25 }
 0xea9   :  { %v2177_v38 = vadd.f32 %v2163_v28, %v3549_v47 }
 0xeaa   :  { %v2176_v29 = vadd.f32 %v2158_v26, %v3552_v5 }
 0xeab   :  { %v2646_v30 = vpop.f32.mrb[20].mxu1 }
 0xeac   :  { %v2167_v31 = vpop.f32.mrb[21].mxu1  ;;  %2180 = vxpose.xlu0.b32.start [1/2] (short) (narrow) %v2176_v29, 32  ;;  %v2173_v39 = vadd.f32 %v2646_v30, %v2344_v22 }
 0xead   :  { %v2168_v32 = vadd.f32 %v2344_v22, %v2167_v31 }
 0xeae   :  { %v2179_v41 = vadd.f32 %v2173_v39, %v3559_v52 }
 0xeaf   :  { %v2178_v40 = vadd.f32 %v2168_v32, %v3562_v11 }
 0xeb0   :  { %2181 = vxpose.xlu0.b32.end [2/2] (short) (narrow) %v2177_v38, 32 }
 0xeb1   :  { %2217 = vxpose.xlu1.b32.start [1/2] (short) (narrow) %v2178_v40, 32 }
 0xeb5   :  { %2218 = vxpose.xlu1.b32.end [2/2] (short) (narrow) %v2179_v41, 32 }
 0xf2c   :  { %v2196_v4 = vpop.trf.xlu0 }
 0xf2d   :  { %2213 = vst.msk [vmem:[%s3664_s14] sm:$0xff] %vm2212_vm3, %v2196_v4 }
 0xf30   :  { %v2197_v5 = vpop.trf.xlu0 }
 0xf31   :  { %v2233_v3 = vpop.trf.xlu1  ;;  %2214 = vst.msk [vmem:[%s3664_s14 + $0x8] sm:$0xff] %vm2212_vm3, %v2197_v5 }
 0xf32   :  { %2349 = vst.msk [vmem:[%s3664_s14 + $0x20] sm:$0xff] %vm2212_vm3, %v2233_v3 }
 0xf34   :  { %v2198_v47 = vpop.trf.xlu0 }
 0xf35   :  { %v2234_v52 = vpop.trf.xlu1  ;;  %2215 = vst.msk [vmem:[%s3664_s14 + $0x10] sm:$0xff] %vm2212_vm3, %v2198_v47 }
 0xf36   :  { %2350 = vst.msk [vmem:[%s3664_s14 + $0x28] sm:$0xff] %vm2212_vm3, %v2234_v52 }
 0xf38   :  { %v2199_v11 = vpop.trf.xlu0 }
 0xf39   :  { %v2235_v43 = vpop.trf.xlu1  ;;  %2216 = vst.msk [vmem:[%s3664_s14 + $0x18] sm:$0xff] %vm2212_vm3, %v2199_v11 }
 0xf3a   :  { %2351 = vst.msk [vmem:[%s3664_s14 + $0x30] sm:$0xff] %vm2212_vm3, %v2235_v43 }
 0xf3d   :  { %v2236_v6 = vpop.trf.xlu1 }
 0xf3e   :  { %2352 = vst.msk [vmem:[%s3664_s14 + $0x38] sm:$0xff] %vm2212_vm3, %v2236_v6 }
 0xf3f   :  { %2258 = vsyncpa [#allocation3], 1 }
 0xf40   :  { %2259 = vsyncpa [#allocation5], 1 }
 0xf41   :  { %2260 = vsyncpa [#allocation8], 1 }

</bundles_post_ra>
